<compile_context>
chip_gen: v6e
topology: v6e:2x2x1
jax: 0.10.0
libtpu: 0.0.40
codegen_flags: <defaults>
</compile_context>

<pallas_src>
import functools

import jax
import jax.numpy as jnp
from jax.experimental import pallas as pl
from jax.experimental.pallas import tpu as pltpu

LN_EPS = 1e-6
_SQRT_2_OVER_PI = 0.7978845608028654
_MXU_MIN_CIN = 16  # route 1x1 convs to the MXU once the contraction dim is big enough

# non-center 3x3 tap offsets, (dy, dx); the tap column index is (dy+1)*3 + (dx+1)
_OFFS = ((-1, -1), (-1, 0), (-1, 1), (0, -1), (0, 1), (1, -1), (1, 0), (1, 1))


def _gelu(x):
    # TODO(synk): PyTorch nn.GELU() is the exact erf GELU; the tanh approximation
    # is used (consistently in kernel and reference) since erf is not guaranteed
    # to lower in Mosaic.  |error| ~ 1e-3 at worst.
    return 0.5 * x * (1.0 + jnp.tanh(_SQRT_2_OVER_PI * (x + 0.044715 * x * x * x)))


# ---------------------------------------------------------------------------
# In-kernel building blocks (operate on a (C, HWp) tile of one batch element)
# ---------------------------------------------------------------------------
def _ln_channels(x, gamma, beta):
    """channels_first LayerNorm over the channel (sublane) axis, eps=1e-6.

    One pass: sum and sum-of-squares are independent reductions (no serial
    mean -> subtract -> square -> mean chain).
    """
    inv_c = 1.0 / x.shape[0]
    m = jnp.sum(x, axis=0, keepdims=True) * inv_c
    m2 = jnp.sum(x * x, axis=0, keepdims=True) * inv_c
    var = jnp.maximum(m2 - m * m, 0.0)
    return gamma * ((x - m) * jax.lax.rsqrt(var + LN_EPS)) + beta


def _pointwise(x, w, bias):
    """1x1 conv: out = w @ x + bias on a (Cin, HWp) tile.

    MXU matmul (f32 accumulate) when Cin is large enough; otherwise a VPU
    broadcast-FMA loop with the bias folded into the accumulator init.
    """
    cin = w.shape[1]
    if cin >= _MXU_MIN_CIN:
        return jnp.dot(w, x, preferred_element_type=jnp.float32) + bias
    acc = w[:, 0:1] * x[0:1, :] + bias
    for ci in range(1, cin):
        acc = acc + w[:, ci:ci + 1] * x[ci:ci + 1, :]
    return acc


def _dwconv3x3(x, taps, bias, masks, W, HWp):
    """Depthwise 3x3 conv (zero padding=1) on a (C, HWp) tile.

    Each non-center tap is a lane-roll of the flattened spatial axis multiplied
    by a precomputed boundary-mask row (masks: (8, HWp), one row per tap).
    The center tap and the bias are folded into the accumulator init.
    taps: (C, 9) laid out as (dy+1)*3 + (dx+1); bias: (C, 1).
    """
    acc = x * taps[:, 4:5] + bias  # center tap (always in-bounds) + bias
    for m, (dy, dx) in enumerate(_OFFS):
        k = (dy + 1) * 3 + (dx + 1)
        off = dy * W + dx
        src = pltpu.roll(x, shift=(-off) % HWp, axis=1)
        acc = acc + (src * masks[m:m + 1, :]) * taps[:, k:k + 1]
    return acc


def _ghpa_kernel(x_ref, scale_ref, masks_ref, g1_ref, b1_ref, wpw1_ref, bpw1_ref,
                 taps1_ref, btap1_ref, g2_ref, b2_ref, taps2_ref, btap2_ref,
                 wpw2_ref, bpw2_ref, o_ref, *, W, HWp, c, unfold):
    x = x_ref[0]                                   # (C, HWp) float32
    C = x.shape[0]
    masks = masks_ref[...]

    # norm1 (channels_first LayerNorm, affine)
    xn = _ln_channels(x, g1_ref[...], b1_ref[...])

    # Branches 1-3: Hadamard product with precomputed (1 + attention) maps;
    # branch-4 rows of the scale map are 1 (passthrough).
    xs = xn * scale_ref[...]

    if unfold:
        # Branch 4 un-folded: the 3c split is sublane-tile aligned, so operate
        # only on the (c, HWp) slice (1x1 -> GELU -> depthwise 3x3).
        h4 = _gelu(_pointwise(xs[3 * c:, :], wpw1_ref[...], bpw1_ref[...]))
        y4 = _dwconv3x3(h4, taps1_ref[...], btap1_ref[...], masks, W, HWp)
        y = jnp.concatenate([xs[:3 * c, :], y4], axis=0)
    else:
        # Tiny-C fallback (c < 8): keep the block-diagonal fold — a slice at 3c
        # would be sub-sublane-tile and cost relayouts that outweigh the extra
        # (small) EUP/VPU work here.
        h = _pointwise(xs, wpw1_ref[...], bpw1_ref[...])
        row = jax.lax.broadcasted_iota(jnp.int32, (C, 1), 0)
        h = jnp.where(row >= 3 * c, _gelu(h), h)   # GELU only on branch-4 rows
        y = _dwconv3x3(h, taps1_ref[...], btap1_ref[...], masks, W, HWp)

    # norm2 + ldw: depthwise 3x3 -> GELU -> 1x1 (dim_in -> dim_out)
    yn = _ln_channels(y, g2_ref[...], b2_ref[...])
    z = _gelu(_dwconv3x3(yn, taps2_ref[...], btap2_ref[...], masks, W, HWp))
    out = _pointwise(z, wpw2_ref[...], bpw2_ref[...])
    o_ref[0] = out.astype(o_ref.dtype)


# ---------------------------------------------------------------------------
# Parameter-only precompute (jnp glue on tiny tensors): bilinear upsample of the
# 8x8 parameter grids (align_corners=True) + the small convs of conv_xy/zx/zy.
# ---------------------------------------------------------------------------
def _interp1d_ac(p, out_size, axis):
    in_size = p.shape[axis]
    if out_size == in_size:
        return p
    if out_size == 1:
        pos = jnp.zeros((1,), jnp.float32)
    else:
        pos = jnp.arange(out_size, dtype=jnp.float32) * (in_size - 1) / (out_size - 1)
    lo = jnp.clip(jnp.floor(pos).astype(jnp.int32), 0, in_size - 1)
    hi = jnp.clip(lo + 1, 0, in_size - 1)
    frac = pos - lo.astype(jnp.float32)
    p_lo = jnp.take(p, lo, axis=axis)
    p_hi = jnp.take(p, hi, axis=axis)
    sh = [1] * p.ndim
    sh[axis] = out_size
    frac = frac.reshape(sh)
    return p_lo * (1.0 - frac) + p_hi * frac


def _jnp_dw2d(v, w, b):
    # v: (C, H, W), w: (C, 3, 3), b: (C,) — depthwise 3x3, pad=1
    Cc, H, W = v.shape
    vp = jnp.pad(v, ((0, 0), (1, 1), (1, 1)))
    out = jnp.zeros_like(v)
    for ky in range(3):
        for kx in range(3):
            out = out + vp[:, ky:ky + H, kx:kx + W] * w[:, ky, kx][:, None, None]
    return out + b[:, None, None]


def _jnp_dw1d(v, w, b):
    # v: (C, L), w: (C, 3), b: (C,) — depthwise conv1d k=3, pad=1
    Cc, L = v.shape
    vp = jnp.pad(v, ((0, 0), (1, 1)))
    out = jnp.zeros_like(v)
    for k in range(3):
        out = out + vp[:, k:k + L] * w[:, k][:, None]
    return out + b[:, None]


def _attention_maps(params, H, W):
    """Returns a_xy (c,H,W), a_zx (c,H), a_zy (c,W): the conv_* outputs."""
    pxy = params["params_xy"][0]                     # (c, gx, gy)
    pxy = _interp1d_ac(pxy, H, axis=1)
    pxy = _interp1d_ac(pxy, W, axis=2)
    a = _jnp_dw2d(pxy, params["conv_xy_dw_w"], params["conv_xy_dw_b"])
    a = _gelu(a)
    a_xy = (jnp.einsum("oc,chw->ohw", params["conv_xy_pw_w"], a)
            + params["conv_xy_pw_b"][:, None, None])
    pzx = _interp1d_ac(params["params_zx"][0, 0], H, axis=1)
    a = _gelu(_jnp_dw1d(pzx, params["conv_zx_dw_w"], params["conv_zx_dw_b"]))
    a_zx = (jnp.einsum("oc,cl->ol", params["conv_zx_pw_w"], a)
            + params["conv_zx_pw_b"][:, None])
    pzy = _interp1d_ac(params["params_zy"][0, 0], W, axis=1)
    a = _gelu(_jnp_dw1d(pzy, params["conv_zy_dw_w"], params["conv_zy_dw_b"]))
    a_zy = (jnp.einsum("oc,cl->ol", params["conv_zy_pw_w"], a)
            + params["conv_zy_pw_b"][:, None])
    return a_xy, a_zx, a_zy


# ---------------------------------------------------------------------------
# Wrapper: builds the kernel operands and launches the fused pallas_call
# ---------------------------------------------------------------------------
@jax.jit
def grouped_hadamard_attention(x, params):
    B, C, H, W = x.shape
    c = C // 4
    HW = H * W
    HWp = ((HW + 127) // 128) * 128                  # lane-dense padded width
    dim_out = params["ldw_pw_w"].shape[0]
    dt = x.dtype
    unfold = (c % 8 == 0)                            # branch-4 slice sublane-aligned?

    a_xy, a_zx, a_zy = _attention_maps(params, H, W)
    s_xy = (1.0 + a_xy).reshape(c, HW)
    s_zx = jnp.broadcast_to((1.0 + a_zx)[:, :, None], (c, H, W)).reshape(c, HW)
    s_zy = jnp.broadcast_to((1.0 + a_zy)[:, None, :], (c, H, W)).reshape(c, HW)
    scale = jnp.concatenate([s_xy, s_zx, s_zy, jnp.ones((c, HW), dt)], axis=0)

    if unfold:
        # raw branch-4 operands; the kernel slices xs[3c:] directly
        wpw1 = params["dw_pw_w"]                     # (c, c)
        bpw1 = params["dw_pw_b"].reshape(c, 1)
        taps1 = params["dw_dw_w"].reshape(c, 9)
        btap1 = params["dw_dw_b"].reshape(c, 1)
    else:
        # block-diagonal fold (identity passthrough rows) — tiny-C fallback
        wpw1 = (jnp.zeros((C, C), dt)
                .at[:3 * c, :3 * c].set(jnp.eye(3 * c, dtype=dt))
                .at[3 * c:, 3 * c:].set(params["dw_pw_w"]))
        bpw1 = jnp.concatenate([jnp.zeros((3 * c,), dt),
                                params["dw_pw_b"]]).reshape(C, 1)
        id_taps = jnp.zeros((3 * c, 9), dt).at[:, 4].set(1.0)
        taps1 = jnp.concatenate([id_taps, params["dw_dw_w"].reshape(c, 9)], axis=0)
        btap1 = jnp.concatenate([jnp.zeros((3 * c,), dt),
                                 params["dw_dw_b"]]).reshape(C, 1)

    taps2 = params["ldw_dw_w"].reshape(C, 9)
    btap2 = params["ldw_dw_b"].reshape(C, 1)
    wpw2 = params["ldw_pw_w"]                        # (dim_out, C)
    bpw2 = params["ldw_pw_b"].reshape(dim_out, 1)
    g1 = params["norm1_w"].reshape(C, 1)
    b1 = params["norm1_b"].reshape(C, 1)
    g2 = params["norm2_w"].reshape(C, 1)
    b2 = params["norm2_b"].reshape(C, 1)

    # precomputed zero-padding boundary masks for the 8 non-center 3x3 taps
    lane = jnp.arange(HWp, dtype=jnp.int32)
    wi, hi = lane % W, lane // W
    masks = jnp.stack([((wi + dx >= 0) & (wi + dx < W) &
                        (hi + dy >= 0) & (hi + dy < H) & (lane < HW))
                       for dy, dx in _OFFS]).astype(jnp.float32)   # (8, HWp)

    x_flat = x.reshape(B, C, HW)                     # free reshape of NCHW
    if HWp != HW:
        x_flat = jnp.pad(x_flat, ((0, 0), (0, 0), (0, HWp - HW)))
        scale = jnp.pad(scale, ((0, 0), (0, HWp - HW)))

    const = lambda n: (0, 0)
    out = pl.pallas_call(
        functools.partial(_ghpa_kernel, W=W, HWp=HWp, c=c, unfold=unfold),
        out_shape=jax.ShapeDtypeStruct((B, dim_out, HWp), dt),
        grid=(B,),
        in_specs=[
            pl.BlockSpec((1, C, HWp), lambda n: (n, 0, 0)),   # x
            pl.BlockSpec((C, HWp), const),                    # (1 + attention) scales
            pl.BlockSpec((8, HWp), const),                    # dwconv boundary masks
            pl.BlockSpec((C, 1), const),                      # norm1 gamma
            pl.BlockSpec((C, 1), const),                      # norm1 beta
            pl.BlockSpec(wpw1.shape, const),                  # branch-4 1x1 weight
            pl.BlockSpec(bpw1.shape, const),                  # branch-4 1x1 bias
            pl.BlockSpec(taps1.shape, const),                 # branch-4 dw taps
            pl.BlockSpec(btap1.shape, const),                 # branch-4 dw bias
            pl.BlockSpec((C, 1), const),                      # norm2 gamma
            pl.BlockSpec((C, 1), const),                      # norm2 beta
            pl.BlockSpec((C, 9), const),                      # ldw dw taps
            pl.BlockSpec((C, 1), const),                      # ldw dw bias
            pl.BlockSpec((dim_out, C), const),                # ldw 1x1 weight
            pl.BlockSpec((dim_out, 1), const),                # ldw 1x1 bias
        ],
        out_specs=pl.BlockSpec((1, dim_out, HWp), lambda n: (n, 0, 0)),
        compiler_params=pltpu.CompilerParams(
            dimension_semantics=("parallel",),
            vmem_limit_bytes=48 * 1024 * 1024),
    )(x_flat, scale, masks, g1, b1, wpw1, bpw1, taps1, btap1, g2, b2,
      taps2, btap2, wpw2, bpw2)
    return out[:, :, :HW].reshape(B, dim_out, H, W)


# ---------------------------------------------------------------------------
# Pure-JAX reference of the module forward (for validation)
# ---------------------------------------------------------------------------
@jax.jit
def reference_forward(x, params):
    B, C, H, W = x.shape

    def ln(v, g, b):
        u = jnp.mean(v, axis=1, keepdims=True)
        s = jnp.mean((v - u) ** 2, axis=1, keepdims=True)
        return (g[None, :, None, None] * ((v - u) * jax.lax.rsqrt(s + LN_EPS))
                + b[None, :, None, None])

    def dw3x3(v, w, b):
        vp = jnp.pad(v, ((0, 0), (0, 0), (1, 1), (1, 1)))
        out = jnp.zeros_like(v)
        for ky in range(3):
            for kx in range(3):
                out = out + vp[:, :, ky:ky + H, kx:kx + W] * w[None, :, ky, kx, None, None]
        return out + b[None, :, None, None]

    a_xy, a_zx, a_zy = _attention_maps(params, H, W)
    xn = ln(x, params["norm1_w"], params["norm1_b"])
    x1, x2, x3, x4 = jnp.split(xn, 4, axis=1)
    x1 = x1 * (1.0 + a_xy)[None]
    x2 = x2 * (1.0 + a_zx)[None, :, :, None]
    x3 = x3 * (1.0 + a_zy)[None, :, None, :]
    h = (jnp.einsum("oc,bchw->bohw", params["dw_pw_w"], x4)
         + params["dw_pw_b"][None, :, None, None])
    x4 = dw3x3(_gelu(h), params["dw_dw_w"], params["dw_dw_b"])
    y = jnp.concatenate([x1, x2, x3, x4], axis=1)
    yn = ln(y, params["norm2_w"], params["norm2_b"])
    z = _gelu(dw3x3(yn, params["ldw_dw_w"], params["ldw_dw_b"]))
    return (jnp.einsum("oc,bchw->bohw", params["ldw_pw_w"], z)
            + params["ldw_pw_b"][None, :, None, None])


# ---------------------------------------------------------------------------
# Synthetic parameters matching the PyTorch module's shapes
# ---------------------------------------------------------------------------
def init_params(key, dim_in, dim_out, grid_x=8, grid_y=8):
    c = dim_in // 4
    keys = iter(jax.random.split(key, 32))

    def nrm(shape, scale=0.2):
        return scale * jax.random.normal(next(keys), shape, jnp.float32)

    return {
        "params_xy": 1.0 + nrm((1, c, grid_x, grid_y), 0.1),
        "conv_xy_dw_w": nrm((c, 3, 3)), "conv_xy_dw_b": nrm((c,), 0.1),
        "conv_xy_pw_w": nrm((c, c)), "conv_xy_pw_b": nrm((c,), 0.1),
        "params_zx": 1.0 + nrm((1, 1, c, grid_x), 0.1),
        "conv_zx_dw_w": nrm((c, 3)), "conv_zx_dw_b": nrm((c,), 0.1),
        "conv_zx_pw_w": nrm((c, c)), "conv_zx_pw_b": nrm((c,), 0.1),
        "params_zy": 1.0 + nrm((1, 1, c, grid_y), 0.1),
        "conv_zy_dw_w": nrm((c, 3)), "conv_zy_dw_b": nrm((c,), 0.1),
        "conv_zy_pw_w": nrm((c, c)), "conv_zy_pw_b": nrm((c,), 0.1),
        "dw_pw_w": nrm((c, c)), "dw_pw_b": nrm((c,), 0.1),
        "dw_dw_w": nrm((c, 3, 3)), "dw_dw_b": nrm((c,), 0.1),
        "norm1_w": 1.0 + nrm((dim_in,), 0.1), "norm1_b": nrm((dim_in,), 0.1),
        "norm2_w": 1.0 + nrm((dim_in,), 0.1), "norm2_b": nrm((dim_in,), 0.1),
        "ldw_dw_w": nrm((dim_in, 3, 3)), "ldw_dw_b": nrm((dim_in,), 0.1),
        "ldw_pw_w": nrm((dim_out, dim_in)), "ldw_pw_b": nrm((dim_out,), 0.1),
    }


if __name__ == "__main__":
    key = jax.random.PRNGKey(0)
    # Config 1 exercises the folded branch-4 / VPU-pointwise fallback (c=2);
    # config 2 exercises the unfolded branch-4 + MXU pointwise paths (c=8).
    configs = [
        (2, 8, 8, 16, 16, 2e-4),
        (2, 32, 32, 16, 16, 5e-3),
    ]
    for (B, dim_in, dim_out, H, W, tol) in configs:
        key, kx, kp = jax.random.split(key, 3)
        x = jax.random.normal(kx, (B, dim_in, H, W), jnp.float32)
        params = init_params(kp, dim_in, dim_out)

        out = jax.block_until_ready(grouped_hadamard_attention(x, params))
        assert out.shape == (B, dim_out, H, W)
        assert bool(jnp.all(jnp.isfinite(out)))

        ref = jax.block_until_ready(reference_forward(x, params))
        err = float(jnp.max(jnp.abs(out - ref)))
        assert err < tol, (
            f"kernel/reference mismatch (dim_in={dim_in}): max abs err = {err}")
    print("KERNEL_OK")
</pallas_src>

<mosaic_0001>
module attributes {stable_mosaic.version = 11 : i64} {
  func.func @_ghpa_kernel(%arg0: i32, %arg1: memref<1x8x256xf32, #tpu.memory_space<vmem>>, %arg2: memref<8x256xf32, #tpu.memory_space<vmem>>, %arg3: memref<8x256xf32, #tpu.memory_space<vmem>>, %arg4: memref<8x1xf32, #tpu.memory_space<vmem>>, %arg5: memref<8x1xf32, #tpu.memory_space<vmem>>, %arg6: memref<8x8xf32, #tpu.memory_space<vmem>>, %arg7: memref<8x1xf32, #tpu.memory_space<vmem>>, %arg8: memref<8x9xf32, #tpu.memory_space<vmem>>, %arg9: memref<8x1xf32, #tpu.memory_space<vmem>>, %arg10: memref<8x1xf32, #tpu.memory_space<vmem>>, %arg11: memref<8x1xf32, #tpu.memory_space<vmem>>, %arg12: memref<8x9xf32, #tpu.memory_space<vmem>>, %arg13: memref<8x1xf32, #tpu.memory_space<vmem>>, %arg14: memref<8x8xf32, #tpu.memory_space<vmem>>, %arg15: memref<8x1xf32, #tpu.memory_space<vmem>>, %arg16: memref<1x8x256xf32, #tpu.memory_space<vmem>>) attributes {dimension_semantics = [#tpu.dimension_semantics<parallel>], iteration_bounds = array<i64: 2>, scalar_prefetch = 0 : i64, scratch_operands = 0 : i64, tpu.core_type = #tpu.core_type<tc>, window_params = [{transform_indices = @transform_0, window_bounds = array<i64: 1, 8, 256>}, {pipeline_mode = #tpu.pipeline_mode<synchronous>, transform_indices = @transform_1, window_bounds = array<i64: 8, 256>}, {pipeline_mode = #tpu.pipeline_mode<synchronous>, transform_indices = @transform_2, window_bounds = array<i64: 8, 256>}, {pipeline_mode = #tpu.pipeline_mode<synchronous>, transform_indices = @transform_3, window_bounds = array<i64: 8, 1>}, {pipeline_mode = #tpu.pipeline_mode<synchronous>, transform_indices = @transform_4, window_bounds = array<i64: 8, 1>}, {pipeline_mode = #tpu.pipeline_mode<synchronous>, transform_indices = @transform_5, window_bounds = array<i64: 8, 8>}, {pipeline_mode = #tpu.pipeline_mode<synchronous>, transform_indices = @transform_6, window_bounds = array<i64: 8, 1>}, {pipeline_mode = #tpu.pipeline_mode<synchronous>, transform_indices = @transform_7, window_bounds = array<i64: 8, 9>}, {pipeline_mode = #tpu.pipeline_mode<synchronous>, transform_indices = @transform_8, window_bounds = array<i64: 8, 1>}, {pipeline_mode = #tpu.pipeline_mode<synchronous>, transform_indices = @transform_9, window_bounds = array<i64: 8, 1>}, {pipeline_mode = #tpu.pipeline_mode<synchronous>, transform_indices = @transform_10, window_bounds = array<i64: 8, 1>}, {pipeline_mode = #tpu.pipeline_mode<synchronous>, transform_indices = @transform_11, window_bounds = array<i64: 8, 9>}, {pipeline_mode = #tpu.pipeline_mode<synchronous>, transform_indices = @transform_12, window_bounds = array<i64: 8, 1>}, {pipeline_mode = #tpu.pipeline_mode<synchronous>, transform_indices = @transform_13, window_bounds = array<i64: 8, 8>}, {pipeline_mode = #tpu.pipeline_mode<synchronous>, transform_indices = @transform_14, window_bounds = array<i64: 8, 1>}, {transform_indices = @transform_15, window_bounds = array<i64: 1, 8, 256>}]} {
    %c0 = arith.constant 0 : index
    %c0_0 = arith.constant 0 : index
    %c0_1 = arith.constant 0 : index
    %0 = vector.load %arg1[%c0, %c0_0, %c0_1] : memref<1x8x256xf32, #tpu.memory_space<vmem>>, vector<1x8x256xf32>
    %1 = vector.shape_cast %0 : vector<1x8x256xf32> to vector<8x256xf32>
    %c0_2 = arith.constant 0 : index
    %c0_3 = arith.constant 0 : index
    %2 = vector.load %arg3[%c0_2, %c0_3] : memref<8x256xf32, #tpu.memory_space<vmem>>, vector<8x256xf32>
    %c0_4 = arith.constant 0 : index
    %c0_5 = arith.constant 0 : index
    %3 = vector.load %arg4[%c0_4, %c0_5] : memref<8x1xf32, #tpu.memory_space<vmem>>, vector<8x1xf32>
    %c0_6 = arith.constant 0 : index
    %c0_7 = arith.constant 0 : index
    %4 = vector.load %arg5[%c0_6, %c0_7] : memref<8x1xf32, #tpu.memory_space<vmem>>, vector<8x1xf32>
    %cst = arith.constant dense<0.000000e+00> : vector<256xf32>
    %5 = vector.multi_reduction <add>, %1, %cst [0] : vector<8x256xf32> to vector<256xf32>
    %6 = vector.shape_cast %5 : vector<256xf32> to vector<1x256xf32>
    %cst_8 = arith.constant 1.250000e-01 : f32
    %7 = vector.broadcast %cst_8 : f32 to vector<1x256xf32>
    %8 = arith.mulf %6, %7 : vector<1x256xf32>
    %9 = arith.mulf %1, %1 : vector<8x256xf32>
    %cst_9 = arith.constant dense<0.000000e+00> : vector<256xf32>
    %10 = vector.multi_reduction <add>, %9, %cst_9 [0] : vector<8x256xf32> to vector<256xf32>
    %11 = vector.shape_cast %10 : vector<256xf32> to vector<1x256xf32>
    %cst_10 = arith.constant 1.250000e-01 : f32
    %12 = vector.broadcast %cst_10 : f32 to vector<1x256xf32>
    %13 = arith.mulf %11, %12 : vector<1x256xf32>
    %14 = arith.mulf %8, %8 : vector<1x256xf32>
    %15 = arith.subf %13, %14 : vector<1x256xf32>
    %cst_11 = arith.constant 0.000000e+00 : f32
    %16 = vector.broadcast %cst_11 : f32 to vector<1x256xf32>
    %17 = arith.maximumf %15, %16 : vector<1x256xf32>
    %18 = vector.broadcast %8 : vector<1x256xf32> to vector<8x256xf32>
    %19 = arith.subf %1, %18 : vector<8x256xf32>
    %cst_12 = arith.constant 9.99999997E-7 : f32
    %20 = vector.broadcast %cst_12 : f32 to vector<1x256xf32>
    %21 = arith.addf %17, %20 : vector<1x256xf32>
    %22 = math.rsqrt %21 : vector<1x256xf32>
    %23 = vector.broadcast %22 : vector<1x256xf32> to vector<8x256xf32>
    %24 = arith.mulf %19, %23 : vector<8x256xf32>
    %25 = vector.broadcast %3 : vector<8x1xf32> to vector<8x256xf32>
    %26 = arith.mulf %25, %24 : vector<8x256xf32>
    %27 = vector.broadcast %4 : vector<8x1xf32> to vector<8x256xf32>
    %28 = arith.addf %26, %27 : vector<8x256xf32>
    %c0_13 = arith.constant 0 : index
    %c0_14 = arith.constant 0 : index
    %29 = vector.load %arg2[%c0_13, %c0_14] : memref<8x256xf32, #tpu.memory_space<vmem>>, vector<8x256xf32>
    %30 = arith.mulf %28, %29 : vector<8x256xf32>
    %c0_15 = arith.constant 0 : index
    %c0_16 = arith.constant 0 : index
    %31 = vector.load %arg6[%c0_15, %c0_16] : memref<8x8xf32, #tpu.memory_space<vmem>>, vector<8x8xf32>
    %c0_17 = arith.constant 0 : index
    %c0_18 = arith.constant 0 : index
    %32 = vector.load %arg7[%c0_17, %c0_18] : memref<8x1xf32, #tpu.memory_space<vmem>>, vector<8x1xf32>
    %33 = vector.extract_strided_slice %31 {offsets = [0, 0], sizes = [8, 1], strides = [1, 1]} : vector<8x8xf32> to vector<8x1xf32>
    %34 = vector.extract_strided_slice %30 {offsets = [0, 0], sizes = [1, 256], strides = [1, 1]} : vector<8x256xf32> to vector<1x256xf32>
    %35 = vector.broadcast %33 : vector<8x1xf32> to vector<8x256xf32>
    %36 = vector.broadcast %34 : vector<1x256xf32> to vector<8x256xf32>
    %37 = arith.mulf %35, %36 : vector<8x256xf32>
    %38 = vector.broadcast %32 : vector<8x1xf32> to vector<8x256xf32>
    %39 = arith.addf %37, %38 : vector<8x256xf32>
    %40 = vector.extract_strided_slice %31 {offsets = [0, 1], sizes = [8, 1], strides = [1, 1]} : vector<8x8xf32> to vector<8x1xf32>
    %41 = vector.extract_strided_slice %30 {offsets = [1, 0], sizes = [1, 256], strides = [1, 1]} : vector<8x256xf32> to vector<1x256xf32>
    %42 = vector.broadcast %40 : vector<8x1xf32> to vector<8x256xf32>
    %43 = vector.broadcast %41 : vector<1x256xf32> to vector<8x256xf32>
    %44 = arith.mulf %42, %43 : vector<8x256xf32>
    %45 = arith.addf %39, %44 : vector<8x256xf32>
    %46 = vector.extract_strided_slice %31 {offsets = [0, 2], sizes = [8, 1], strides = [1, 1]} : vector<8x8xf32> to vector<8x1xf32>
    %47 = vector.extract_strided_slice %30 {offsets = [2, 0], sizes = [1, 256], strides = [1, 1]} : vector<8x256xf32> to vector<1x256xf32>
    %48 = vector.broadcast %46 : vector<8x1xf32> to vector<8x256xf32>
    %49 = vector.broadcast %47 : vector<1x256xf32> to vector<8x256xf32>
    %50 = arith.mulf %48, %49 : vector<8x256xf32>
    %51 = arith.addf %45, %50 : vector<8x256xf32>
    %52 = vector.extract_strided_slice %31 {offsets = [0, 3], sizes = [8, 1], strides = [1, 1]} : vector<8x8xf32> to vector<8x1xf32>
    %53 = vector.extract_strided_slice %30 {offsets = [3, 0], sizes = [1, 256], strides = [1, 1]} : vector<8x256xf32> to vector<1x256xf32>
    %54 = vector.broadcast %52 : vector<8x1xf32> to vector<8x256xf32>
    %55 = vector.broadcast %53 : vector<1x256xf32> to vector<8x256xf32>
    %56 = arith.mulf %54, %55 : vector<8x256xf32>
    %57 = arith.addf %51, %56 : vector<8x256xf32>
    %58 = vector.extract_strided_slice %31 {offsets = [0, 4], sizes = [8, 1], strides = [1, 1]} : vector<8x8xf32> to vector<8x1xf32>
    %59 = vector.extract_strided_slice %30 {offsets = [4, 0], sizes = [1, 256], strides = [1, 1]} : vector<8x256xf32> to vector<1x256xf32>
    %60 = vector.broadcast %58 : vector<8x1xf32> to vector<8x256xf32>
    %61 = vector.broadcast %59 : vector<1x256xf32> to vector<8x256xf32>
    %62 = arith.mulf %60, %61 : vector<8x256xf32>
    %63 = arith.addf %57, %62 : vector<8x256xf32>
    %64 = vector.extract_strided_slice %31 {offsets = [0, 5], sizes = [8, 1], strides = [1, 1]} : vector<8x8xf32> to vector<8x1xf32>
    %65 = vector.extract_strided_slice %30 {offsets = [5, 0], sizes = [1, 256], strides = [1, 1]} : vector<8x256xf32> to vector<1x256xf32>
    %66 = vector.broadcast %64 : vector<8x1xf32> to vector<8x256xf32>
    %67 = vector.broadcast %65 : vector<1x256xf32> to vector<8x256xf32>
    %68 = arith.mulf %66, %67 : vector<8x256xf32>
    %69 = arith.addf %63, %68 : vector<8x256xf32>
    %70 = vector.extract_strided_slice %31 {offsets = [0, 6], sizes = [8, 1], strides = [1, 1]} : vector<8x8xf32> to vector<8x1xf32>
    %71 = vector.extract_strided_slice %30 {offsets = [6, 0], sizes = [1, 256], strides = [1, 1]} : vector<8x256xf32> to vector<1x256xf32>
    %72 = vector.broadcast %70 : vector<8x1xf32> to vector<8x256xf32>
    %73 = vector.broadcast %71 : vector<1x256xf32> to vector<8x256xf32>
    %74 = arith.mulf %72, %73 : vector<8x256xf32>
    %75 = arith.addf %69, %74 : vector<8x256xf32>
    %76 = vector.extract_strided_slice %31 {offsets = [0, 7], sizes = [8, 1], strides = [1, 1]} : vector<8x8xf32> to vector<8x1xf32>
    %77 = vector.extract_strided_slice %30 {offsets = [7, 0], sizes = [1, 256], strides = [1, 1]} : vector<8x256xf32> to vector<1x256xf32>
    %78 = vector.broadcast %76 : vector<8x1xf32> to vector<8x256xf32>
    %79 = vector.broadcast %77 : vector<1x256xf32> to vector<8x256xf32>
    %80 = arith.mulf %78, %79 : vector<8x256xf32>
    %81 = arith.addf %75, %80 : vector<8x256xf32>
    %82 = tpu.iota {dimensions = array<i32: 0>} : vector<8x1xi32>
    %c6_i32 = arith.constant 6 : i32
    %83 = vector.broadcast %c6_i32 : i32 to vector<8x1xi32>
    %84 = arith.cmpi sge, %82, %83 : vector<8x1xi32>
    %cst_19 = arith.constant 5.000000e-01 : f32
    %85 = vector.broadcast %cst_19 : f32 to vector<8x256xf32>
    %86 = arith.mulf %85, %81 : vector<8x256xf32>
    %cst_20 = arith.constant 4.471500e-02 : f32
    %87 = vector.broadcast %cst_20 : f32 to vector<8x256xf32>
    %88 = arith.mulf %87, %81 : vector<8x256xf32>
    %89 = arith.mulf %88, %81 : vector<8x256xf32>
    %90 = arith.mulf %89, %81 : vector<8x256xf32>
    %91 = arith.addf %81, %90 : vector<8x256xf32>
    %cst_21 = arith.constant 0.797884583 : f32
    %92 = vector.broadcast %cst_21 : f32 to vector<8x256xf32>
    %93 = arith.mulf %92, %91 : vector<8x256xf32>
    %94 = math.tanh %93 : vector<8x256xf32>
    %cst_22 = arith.constant 1.000000e+00 : f32
    %95 = vector.broadcast %cst_22 : f32 to vector<8x256xf32>
    %96 = arith.addf %95, %94 : vector<8x256xf32>
    %97 = arith.mulf %86, %96 : vector<8x256xf32>
    %98 = vector.shape_cast %84 : vector<8x1xi1> to vector<8x1xi1>
    %99 = vector.broadcast %98 : vector<8x1xi1> to vector<8x256xi1>
    %100 = arith.select %99, %97, %81 : vector<8x256xi1>, vector<8x256xf32>
    %c0_23 = arith.constant 0 : index
    %c0_24 = arith.constant 0 : index
    %101 = vector.load %arg8[%c0_23, %c0_24] : memref<8x9xf32, #tpu.memory_space<vmem>>, vector<8x9xf32>
    %c0_25 = arith.constant 0 : index
    %c0_26 = arith.constant 0 : index
    %102 = vector.load %arg9[%c0_25, %c0_26] : memref<8x1xf32, #tpu.memory_space<vmem>>, vector<8x1xf32>
    %103 = vector.extract_strided_slice %101 {offsets = [0, 4], sizes = [8, 1], strides = [1, 1]} : vector<8x9xf32> to vector<8x1xf32>
    %104 = vector.broadcast %103 : vector<8x1xf32> to vector<8x256xf32>
    %105 = arith.mulf %100, %104 : vector<8x256xf32>
    %106 = vector.broadcast %102 : vector<8x1xf32> to vector<8x256xf32>
    %107 = arith.addf %105, %106 : vector<8x256xf32>
    %c17_i32 = arith.constant 17 : i32
    %108 = tpu.dynamic_rotate %100 by %c17_i32 dim 1 : vector<8x256xf32>, i32 -> vector<8x256xf32>
    %109 = vector.extract_strided_slice %2 {offsets = [0, 0], sizes = [1, 256], strides = [1, 1]} : vector<8x256xf32> to vector<1x256xf32>
    %110 = vector.broadcast %109 : vector<1x256xf32> to vector<8x256xf32>
    %111 = arith.mulf %108, %110 : vector<8x256xf32>
    %112 = vector.extract_strided_slice %101 {offsets = [0, 0], sizes = [8, 1], strides = [1, 1]} : vector<8x9xf32> to vector<8x1xf32>
    %113 = vector.broadcast %112 : vector<8x1xf32> to vector<8x256xf32>
    %114 = arith.mulf %111, %113 : vector<8x256xf32>
    %115 = arith.addf %107, %114 : vector<8x256xf32>
    %c16_i32 = arith.constant 16 : i32
    %116 = tpu.dynamic_rotate %100 by %c16_i32 dim 1 : vector<8x256xf32>, i32 -> vector<8x256xf32>
    %117 = vector.extract_strided_slice %2 {offsets = [1, 0], sizes = [1, 256], strides = [1, 1]} : vector<8x256xf32> to vector<1x256xf32>
    %118 = vector.broadcast %117 : vector<1x256xf32> to vector<8x256xf32>
    %119 = arith.mulf %116, %118 : vector<8x256xf32>
    %120 = vector.extract_strided_slice %101 {offsets = [0, 1], sizes = [8, 1], strides = [1, 1]} : vector<8x9xf32> to vector<8x1xf32>
    %121 = vector.broadcast %120 : vector<8x1xf32> to vector<8x256xf32>
    %122 = arith.mulf %119, %121 : vector<8x256xf32>
    %123 = arith.addf %115, %122 : vector<8x256xf32>
    %c15_i32 = arith.constant 15 : i32
    %124 = tpu.dynamic_rotate %100 by %c15_i32 dim 1 : vector<8x256xf32>, i32 -> vector<8x256xf32>
    %125 = vector.extract_strided_slice %2 {offsets = [2, 0], sizes = [1, 256], strides = [1, 1]} : vector<8x256xf32> to vector<1x256xf32>
    %126 = vector.broadcast %125 : vector<1x256xf32> to vector<8x256xf32>
    %127 = arith.mulf %124, %126 : vector<8x256xf32>
    %128 = vector.extract_strided_slice %101 {offsets = [0, 2], sizes = [8, 1], strides = [1, 1]} : vector<8x9xf32> to vector<8x1xf32>
    %129 = vector.broadcast %128 : vector<8x1xf32> to vector<8x256xf32>
    %130 = arith.mulf %127, %129 : vector<8x256xf32>
    %131 = arith.addf %123, %130 : vector<8x256xf32>
    %c1_i32 = arith.constant 1 : i32
    %132 = tpu.dynamic_rotate %100 by %c1_i32 dim 1 : vector<8x256xf32>, i32 -> vector<8x256xf32>
    %133 = vector.extract_strided_slice %2 {offsets = [3, 0], sizes = [1, 256], strides = [1, 1]} : vector<8x256xf32> to vector<1x256xf32>
    %134 = vector.broadcast %133 : vector<1x256xf32> to vector<8x256xf32>
    %135 = arith.mulf %132, %134 : vector<8x256xf32>
    %136 = vector.extract_strided_slice %101 {offsets = [0, 3], sizes = [8, 1], strides = [1, 1]} : vector<8x9xf32> to vector<8x1xf32>
    %137 = vector.broadcast %136 : vector<8x1xf32> to vector<8x256xf32>
    %138 = arith.mulf %135, %137 : vector<8x256xf32>
    %139 = arith.addf %131, %138 : vector<8x256xf32>
    %c255_i32 = arith.constant 255 : i32
    %140 = tpu.dynamic_rotate %100 by %c255_i32 dim 1 : vector<8x256xf32>, i32 -> vector<8x256xf32>
    %141 = vector.extract_strided_slice %2 {offsets = [4, 0], sizes = [1, 256], strides = [1, 1]} : vector<8x256xf32> to vector<1x256xf32>
    %142 = vector.broadcast %141 : vector<1x256xf32> to vector<8x256xf32>
    %143 = arith.mulf %140, %142 : vector<8x256xf32>
    %144 = vector.extract_strided_slice %101 {offsets = [0, 5], sizes = [8, 1], strides = [1, 1]} : vector<8x9xf32> to vector<8x1xf32>
    %145 = vector.broadcast %144 : vector<8x1xf32> to vector<8x256xf32>
    %146 = arith.mulf %143, %145 : vector<8x256xf32>
    %147 = arith.addf %139, %146 : vector<8x256xf32>
    %c241_i32 = arith.constant 241 : i32
    %148 = tpu.dynamic_rotate %100 by %c241_i32 dim 1 : vector<8x256xf32>, i32 -> vector<8x256xf32>
    %149 = vector.extract_strided_slice %2 {offsets = [5, 0], sizes = [1, 256], strides = [1, 1]} : vector<8x256xf32> to vector<1x256xf32>
    %150 = vector.broadcast %149 : vector<1x256xf32> to vector<8x256xf32>
    %151 = arith.mulf %148, %150 : vector<8x256xf32>
    %152 = vector.extract_strided_slice %101 {offsets = [0, 6], sizes = [8, 1], strides = [1, 1]} : vector<8x9xf32> to vector<8x1xf32>
    %153 = vector.broadcast %152 : vector<8x1xf32> to vector<8x256xf32>
    %154 = arith.mulf %151, %153 : vector<8x256xf32>
    %155 = arith.addf %147, %154 : vector<8x256xf32>
    %c240_i32 = arith.constant 240 : i32
    %156 = tpu.dynamic_rotate %100 by %c240_i32 dim 1 : vector<8x256xf32>, i32 -> vector<8x256xf32>
    %157 = vector.extract_strided_slice %2 {offsets = [6, 0], sizes = [1, 256], strides = [1, 1]} : vector<8x256xf32> to vector<1x256xf32>
    %158 = vector.broadcast %157 : vector<1x256xf32> to vector<8x256xf32>
    %159 = arith.mulf %156, %158 : vector<8x256xf32>
    %160 = vector.extract_strided_slice %101 {offsets = [0, 7], sizes = [8, 1], strides = [1, 1]} : vector<8x9xf32> to vector<8x1xf32>
    %161 = vector.broadcast %160 : vector<8x1xf32> to vector<8x256xf32>
    %162 = arith.mulf %159, %161 : vector<8x256xf32>
    %163 = arith.addf %155, %162 : vector<8x256xf32>
    %c239_i32 = arith.constant 239 : i32
    %164 = tpu.dynamic_rotate %100 by %c239_i32 dim 1 : vector<8x256xf32>, i32 -> vector<8x256xf32>
    %165 = vector.extract_strided_slice %2 {offsets = [7, 0], sizes = [1, 256], strides = [1, 1]} : vector<8x256xf32> to vector<1x256xf32>
    %166 = vector.broadcast %165 : vector<1x256xf32> to vector<8x256xf32>
    %167 = arith.mulf %164, %166 : vector<8x256xf32>
    %168 = vector.extract_strided_slice %101 {offsets = [0, 8], sizes = [8, 1], strides = [1, 1]} : vector<8x9xf32> to vector<8x1xf32>
    %169 = vector.broadcast %168 : vector<8x1xf32> to vector<8x256xf32>
    %170 = arith.mulf %167, %169 : vector<8x256xf32>
    %171 = arith.addf %163, %170 : vector<8x256xf32>
    %c0_27 = arith.constant 0 : index
    %c0_28 = arith.constant 0 : index
    %172 = vector.load %arg10[%c0_27, %c0_28] : memref<8x1xf32, #tpu.memory_space<vmem>>, vector<8x1xf32>
    %c0_29 = arith.constant 0 : index
    %c0_30 = arith.constant 0 : index
    %173 = vector.load %arg11[%c0_29, %c0_30] : memref<8x1xf32, #tpu.memory_space<vmem>>, vector<8x1xf32>
    %cst_31 = arith.constant dense<0.000000e+00> : vector<256xf32>
    %174 = vector.multi_reduction <add>, %171, %cst_31 [0] : vector<8x256xf32> to vector<256xf32>
    %175 = vector.shape_cast %174 : vector<256xf32> to vector<1x256xf32>
    %cst_32 = arith.constant 1.250000e-01 : f32
    %176 = vector.broadcast %cst_32 : f32 to vector<1x256xf32>
    %177 = arith.mulf %175, %176 : vector<1x256xf32>
    %178 = arith.mulf %171, %171 : vector<8x256xf32>
    %cst_33 = arith.constant dense<0.000000e+00> : vector<256xf32>
    %179 = vector.multi_reduction <add>, %178, %cst_33 [0] : vector<8x256xf32> to vector<256xf32>
    %180 = vector.shape_cast %179 : vector<256xf32> to vector<1x256xf32>
    %cst_34 = arith.constant 1.250000e-01 : f32
    %181 = vector.broadcast %cst_34 : f32 to vector<1x256xf32>
    %182 = arith.mulf %180, %181 : vector<1x256xf32>
    %183 = arith.mulf %177, %177 : vector<1x256xf32>
    %184 = arith.subf %182, %183 : vector<1x256xf32>
    %cst_35 = arith.constant 0.000000e+00 : f32
    %185 = vector.broadcast %cst_35 : f32 to vector<1x256xf32>
    %186 = arith.maximumf %184, %185 : vector<1x256xf32>
    %187 = vector.broadcast %177 : vector<1x256xf32> to vector<8x256xf32>
    %188 = arith.subf %171, %187 : vector<8x256xf32>
    %cst_36 = arith.constant 9.99999997E-7 : f32
    %189 = vector.broadcast %cst_36 : f32 to vector<1x256xf32>
    %190 = arith.addf %186, %189 : vector<1x256xf32>
    %191 = math.rsqrt %190 : vector<1x256xf32>
    %192 = vector.broadcast %191 : vector<1x256xf32> to vector<8x256xf32>
    %193 = arith.mulf %188, %192 : vector<8x256xf32>
    %194 = vector.broadcast %172 : vector<8x1xf32> to vector<8x256xf32>
    %195 = arith.mulf %194, %193 : vector<8x256xf32>
    %196 = vector.broadcast %173 : vector<8x1xf32> to vector<8x256xf32>
    %197 = arith.addf %195, %196 : vector<8x256xf32>
    %c0_37 = arith.constant 0 : index
    %c0_38 = arith.constant 0 : index
    %198 = vector.load %arg12[%c0_37, %c0_38] : memref<8x9xf32, #tpu.memory_space<vmem>>, vector<8x9xf32>
    %c0_39 = arith.constant 0 : index
    %c0_40 = arith.constant 0 : index
    %199 = vector.load %arg13[%c0_39, %c0_40] : memref<8x1xf32, #tpu.memory_space<vmem>>, vector<8x1xf32>
    %200 = vector.extract_strided_slice %198 {offsets = [0, 4], sizes = [8, 1], strides = [1, 1]} : vector<8x9xf32> to vector<8x1xf32>
    %201 = vector.broadcast %200 : vector<8x1xf32> to vector<8x256xf32>
    %202 = arith.mulf %197, %201 : vector<8x256xf32>
    %203 = vector.broadcast %199 : vector<8x1xf32> to vector<8x256xf32>
    %204 = arith.addf %202, %203 : vector<8x256xf32>
    %c17_i32_41 = arith.constant 17 : i32
    %205 = tpu.dynamic_rotate %197 by %c17_i32_41 dim 1 : vector<8x256xf32>, i32 -> vector<8x256xf32>
    %206 = vector.extract_strided_slice %2 {offsets = [0, 0], sizes = [1, 256], strides = [1, 1]} : vector<8x256xf32> to vector<1x256xf32>
    %207 = vector.broadcast %206 : vector<1x256xf32> to vector<8x256xf32>
    %208 = arith.mulf %205, %207 : vector<8x256xf32>
    %209 = vector.extract_strided_slice %198 {offsets = [0, 0], sizes = [8, 1], strides = [1, 1]} : vector<8x9xf32> to vector<8x1xf32>
    %210 = vector.broadcast %209 : vector<8x1xf32> to vector<8x256xf32>
    %211 = arith.mulf %208, %210 : vector<8x256xf32>
    %212 = arith.addf %204, %211 : vector<8x256xf32>
    %c16_i32_42 = arith.constant 16 : i32
    %213 = tpu.dynamic_rotate %197 by %c16_i32_42 dim 1 : vector<8x256xf32>, i32 -> vector<8x256xf32>
    %214 = vector.extract_strided_slice %2 {offsets = [1, 0], sizes = [1, 256], strides = [1, 1]} : vector<8x256xf32> to vector<1x256xf32>
    %215 = vector.broadcast %214 : vector<1x256xf32> to vector<8x256xf32>
    %216 = arith.mulf %213, %215 : vector<8x256xf32>
    %217 = vector.extract_strided_slice %198 {offsets = [0, 1], sizes = [8, 1], strides = [1, 1]} : vector<8x9xf32> to vector<8x1xf32>
    %218 = vector.broadcast %217 : vector<8x1xf32> to vector<8x256xf32>
    %219 = arith.mulf %216, %218 : vector<8x256xf32>
    %220 = arith.addf %212, %219 : vector<8x256xf32>
    %c15_i32_43 = arith.constant 15 : i32
    %221 = tpu.dynamic_rotate %197 by %c15_i32_43 dim 1 : vector<8x256xf32>, i32 -> vector<8x256xf32>
    %222 = vector.extract_strided_slice %2 {offsets = [2, 0], sizes = [1, 256], strides = [1, 1]} : vector<8x256xf32> to vector<1x256xf32>
    %223 = vector.broadcast %222 : vector<1x256xf32> to vector<8x256xf32>
    %224 = arith.mulf %221, %223 : vector<8x256xf32>
    %225 = vector.extract_strided_slice %198 {offsets = [0, 2], sizes = [8, 1], strides = [1, 1]} : vector<8x9xf32> to vector<8x1xf32>
    %226 = vector.broadcast %225 : vector<8x1xf32> to vector<8x256xf32>
    %227 = arith.mulf %224, %226 : vector<8x256xf32>
    %228 = arith.addf %220, %227 : vector<8x256xf32>
    %c1_i32_44 = arith.constant 1 : i32
    %229 = tpu.dynamic_rotate %197 by %c1_i32_44 dim 1 : vector<8x256xf32>, i32 -> vector<8x256xf32>
    %230 = vector.extract_strided_slice %2 {offsets = [3, 0], sizes = [1, 256], strides = [1, 1]} : vector<8x256xf32> to vector<1x256xf32>
    %231 = vector.broadcast %230 : vector<1x256xf32> to vector<8x256xf32>
    %232 = arith.mulf %229, %231 : vector<8x256xf32>
    %233 = vector.extract_strided_slice %198 {offsets = [0, 3], sizes = [8, 1], strides = [1, 1]} : vector<8x9xf32> to vector<8x1xf32>
    %234 = vector.broadcast %233 : vector<8x1xf32> to vector<8x256xf32>
    %235 = arith.mulf %232, %234 : vector<8x256xf32>
    %236 = arith.addf %228, %235 : vector<8x256xf32>
    %c255_i32_45 = arith.constant 255 : i32
    %237 = tpu.dynamic_rotate %197 by %c255_i32_45 dim 1 : vector<8x256xf32>, i32 -> vector<8x256xf32>
    %238 = vector.extract_strided_slice %2 {offsets = [4, 0], sizes = [1, 256], strides = [1, 1]} : vector<8x256xf32> to vector<1x256xf32>
    %239 = vector.broadcast %238 : vector<1x256xf32> to vector<8x256xf32>
    %240 = arith.mulf %237, %239 : vector<8x256xf32>
    %241 = vector.extract_strided_slice %198 {offsets = [0, 5], sizes = [8, 1], strides = [1, 1]} : vector<8x9xf32> to vector<8x1xf32>
    %242 = vector.broadcast %241 : vector<8x1xf32> to vector<8x256xf32>
    %243 = arith.mulf %240, %242 : vector<8x256xf32>
    %244 = arith.addf %236, %243 : vector<8x256xf32>
    %c241_i32_46 = arith.constant 241 : i32
    %245 = tpu.dynamic_rotate %197 by %c241_i32_46 dim 1 : vector<8x256xf32>, i32 -> vector<8x256xf32>
    %246 = vector.extract_strided_slice %2 {offsets = [5, 0], sizes = [1, 256], strides = [1, 1]} : vector<8x256xf32> to vector<1x256xf32>
    %247 = vector.broadcast %246 : vector<1x256xf32> to vector<8x256xf32>
    %248 = arith.mulf %245, %247 : vector<8x256xf32>
    %249 = vector.extract_strided_slice %198 {offsets = [0, 6], sizes = [8, 1], strides = [1, 1]} : vector<8x9xf32> to vector<8x1xf32>
    %250 = vector.broadcast %249 : vector<8x1xf32> to vector<8x256xf32>
    %251 = arith.mulf %248, %250 : vector<8x256xf32>
    %252 = arith.addf %244, %251 : vector<8x256xf32>
    %c240_i32_47 = arith.constant 240 : i32
    %253 = tpu.dynamic_rotate %197 by %c240_i32_47 dim 1 : vector<8x256xf32>, i32 -> vector<8x256xf32>
    %254 = vector.extract_strided_slice %2 {offsets = [6, 0], sizes = [1, 256], strides = [1, 1]} : vector<8x256xf32> to vector<1x256xf32>
    %255 = vector.broadcast %254 : vector<1x256xf32> to vector<8x256xf32>
    %256 = arith.mulf %253, %255 : vector<8x256xf32>
    %257 = vector.extract_strided_slice %198 {offsets = [0, 7], sizes = [8, 1], strides = [1, 1]} : vector<8x9xf32> to vector<8x1xf32>
    %258 = vector.broadcast %257 : vector<8x1xf32> to vector<8x256xf32>
    %259 = arith.mulf %256, %258 : vector<8x256xf32>
    %260 = arith.addf %252, %259 : vector<8x256xf32>
    %c239_i32_48 = arith.constant 239 : i32
    %261 = tpu.dynamic_rotate %197 by %c239_i32_48 dim 1 : vector<8x256xf32>, i32 -> vector<8x256xf32>
    %262 = vector.extract_strided_slice %2 {offsets = [7, 0], sizes = [1, 256], strides = [1, 1]} : vector<8x256xf32> to vector<1x256xf32>
    %263 = vector.broadcast %262 : vector<1x256xf32> to vector<8x256xf32>
    %264 = arith.mulf %261, %263 : vector<8x256xf32>
    %265 = vector.extract_strided_slice %198 {offsets = [0, 8], sizes = [8, 1], strides = [1, 1]} : vector<8x9xf32> to vector<8x1xf32>
    %266 = vector.broadcast %265 : vector<8x1xf32> to vector<8x256xf32>
    %267 = arith.mulf %264, %266 : vector<8x256xf32>
    %268 = arith.addf %260, %267 : vector<8x256xf32>
    %cst_49 = arith.constant 5.000000e-01 : f32
    %269 = vector.broadcast %cst_49 : f32 to vector<8x256xf32>
    %270 = arith.mulf %269, %268 : vector<8x256xf32>
    %cst_50 = arith.constant 4.471500e-02 : f32
    %271 = vector.broadcast %cst_50 : f32 to vector<8x256xf32>
    %272 = arith.mulf %271, %268 : vector<8x256xf32>
    %273 = arith.mulf %272, %268 : vector<8x256xf32>
    %274 = arith.mulf %273, %268 : vector<8x256xf32>
    %275 = arith.addf %268, %274 : vector<8x256xf32>
    %cst_51 = arith.constant 0.797884583 : f32
    %276 = vector.broadcast %cst_51 : f32 to vector<8x256xf32>
    %277 = arith.mulf %276, %275 : vector<8x256xf32>
    %278 = math.tanh %277 : vector<8x256xf32>
    %cst_52 = arith.constant 1.000000e+00 : f32
    %279 = vector.broadcast %cst_52 : f32 to vector<8x256xf32>
    %280 = arith.addf %279, %278 : vector<8x256xf32>
    %281 = arith.mulf %270, %280 : vector<8x256xf32>
    %c0_53 = arith.constant 0 : index
    %c0_54 = arith.constant 0 : index
    %282 = vector.load %arg14[%c0_53, %c0_54] : memref<8x8xf32, #tpu.memory_space<vmem>>, vector<8x8xf32>
    %c0_55 = arith.constant 0 : index
    %c0_56 = arith.constant 0 : index
    %283 = vector.load %arg15[%c0_55, %c0_56] : memref<8x1xf32, #tpu.memory_space<vmem>>, vector<8x1xf32>
    %284 = vector.extract_strided_slice %282 {offsets = [0, 0], sizes = [8, 1], strides = [1, 1]} : vector<8x8xf32> to vector<8x1xf32>
    %285 = vector.extract_strided_slice %281 {offsets = [0, 0], sizes = [1, 256], strides = [1, 1]} : vector<8x256xf32> to vector<1x256xf32>
    %286 = vector.broadcast %284 : vector<8x1xf32> to vector<8x256xf32>
    %287 = vector.broadcast %285 : vector<1x256xf32> to vector<8x256xf32>
    %288 = arith.mulf %286, %287 : vector<8x256xf32>
    %289 = vector.broadcast %283 : vector<8x1xf32> to vector<8x256xf32>
    %290 = arith.addf %288, %289 : vector<8x256xf32>
    %291 = vector.extract_strided_slice %282 {offsets = [0, 1], sizes = [8, 1], strides = [1, 1]} : vector<8x8xf32> to vector<8x1xf32>
    %292 = vector.extract_strided_slice %281 {offsets = [1, 0], sizes = [1, 256], strides = [1, 1]} : vector<8x256xf32> to vector<1x256xf32>
    %293 = vector.broadcast %291 : vector<8x1xf32> to vector<8x256xf32>
    %294 = vector.broadcast %292 : vector<1x256xf32> to vector<8x256xf32>
    %295 = arith.mulf %293, %294 : vector<8x256xf32>
    %296 = arith.addf %290, %295 : vector<8x256xf32>
    %297 = vector.extract_strided_slice %282 {offsets = [0, 2], sizes = [8, 1], strides = [1, 1]} : vector<8x8xf32> to vector<8x1xf32>
    %298 = vector.extract_strided_slice %281 {offsets = [2, 0], sizes = [1, 256], strides = [1, 1]} : vector<8x256xf32> to vector<1x256xf32>
    %299 = vector.broadcast %297 : vector<8x1xf32> to vector<8x256xf32>
    %300 = vector.broadcast %298 : vector<1x256xf32> to vector<8x256xf32>
    %301 = arith.mulf %299, %300 : vector<8x256xf32>
    %302 = arith.addf %296, %301 : vector<8x256xf32>
    %303 = vector.extract_strided_slice %282 {offsets = [0, 3], sizes = [8, 1], strides = [1, 1]} : vector<8x8xf32> to vector<8x1xf32>
    %304 = vector.extract_strided_slice %281 {offsets = [3, 0], sizes = [1, 256], strides = [1, 1]} : vector<8x256xf32> to vector<1x256xf32>
    %305 = vector.broadcast %303 : vector<8x1xf32> to vector<8x256xf32>
    %306 = vector.broadcast %304 : vector<1x256xf32> to vector<8x256xf32>
    %307 = arith.mulf %305, %306 : vector<8x256xf32>
    %308 = arith.addf %302, %307 : vector<8x256xf32>
    %309 = vector.extract_strided_slice %282 {offsets = [0, 4], sizes = [8, 1], strides = [1, 1]} : vector<8x8xf32> to vector<8x1xf32>
    %310 = vector.extract_strided_slice %281 {offsets = [4, 0], sizes = [1, 256], strides = [1, 1]} : vector<8x256xf32> to vector<1x256xf32>
    %311 = vector.broadcast %309 : vector<8x1xf32> to vector<8x256xf32>
    %312 = vector.broadcast %310 : vector<1x256xf32> to vector<8x256xf32>
    %313 = arith.mulf %311, %312 : vector<8x256xf32>
    %314 = arith.addf %308, %313 : vector<8x256xf32>
    %315 = vector.extract_strided_slice %282 {offsets = [0, 5], sizes = [8, 1], strides = [1, 1]} : vector<8x8xf32> to vector<8x1xf32>
    %316 = vector.extract_strided_slice %281 {offsets = [5, 0], sizes = [1, 256], strides = [1, 1]} : vector<8x256xf32> to vector<1x256xf32>
    %317 = vector.broadcast %315 : vector<8x1xf32> to vector<8x256xf32>
    %318 = vector.broadcast %316 : vector<1x256xf32> to vector<8x256xf32>
    %319 = arith.mulf %317, %318 : vector<8x256xf32>
    %320 = arith.addf %314, %319 : vector<8x256xf32>
    %321 = vector.extract_strided_slice %282 {offsets = [0, 6], sizes = [8, 1], strides = [1, 1]} : vector<8x8xf32> to vector<8x1xf32>
    %322 = vector.extract_strided_slice %281 {offsets = [6, 0], sizes = [1, 256], strides = [1, 1]} : vector<8x256xf32> to vector<1x256xf32>
    %323 = vector.broadcast %321 : vector<8x1xf32> to vector<8x256xf32>
    %324 = vector.broadcast %322 : vector<1x256xf32> to vector<8x256xf32>
    %325 = arith.mulf %323, %324 : vector<8x256xf32>
    %326 = arith.addf %320, %325 : vector<8x256xf32>
    %327 = vector.extract_strided_slice %282 {offsets = [0, 7], sizes = [8, 1], strides = [1, 1]} : vector<8x8xf32> to vector<8x1xf32>
    %328 = vector.extract_strided_slice %281 {offsets = [7, 0], sizes = [1, 256], strides = [1, 1]} : vector<8x256xf32> to vector<1x256xf32>
    %329 = vector.broadcast %327 : vector<8x1xf32> to vector<8x256xf32>
    %330 = vector.broadcast %328 : vector<1x256xf32> to vector<8x256xf32>
    %331 = arith.mulf %329, %330 : vector<8x256xf32>
    %332 = arith.addf %326, %331 : vector<8x256xf32>
    %c0_57 = arith.constant 0 : index
    %c0_58 = arith.constant 0 : index
    %c0_59 = arith.constant 0 : index
    %333 = vector.load %arg16[%c0_57, %c0_58, %c0_59] : memref<1x8x256xf32, #tpu.memory_space<vmem>>, vector<1x8x256xf32>
    %334 = vector.shape_cast %333 : vector<1x8x256xf32> to vector<8x256xf32>
    %335 = vector.shape_cast %332 : vector<8x256xf32> to vector<1x8x256xf32>
    tpu.vector_store %arg16[%c0_57, %c0_58, %c0_59], %335 {strides = array<i32>} : memref<1x8x256xf32, #tpu.memory_space<vmem>>, vector<1x8x256xf32>,
    return
  }
  func.func @transform_0(%arg0: i32) -> (i32, i32, i32) {
    %c0_i32 = arith.constant 0 : i32
    %c0_i32_0 = arith.constant 0 : i32
    %c0_i32_1 = arith.constant 0 : i32
    return %arg0, %c0_i32, %c0_i32_0 : i32, i32, i32
  }
  func.func @transform_1(%arg0: i32) -> (i32, i32) {
    %c0_i32 = arith.constant 0 : i32
    %c0_i32_0 = arith.constant 0 : i32
    %c0_i32_1 = arith.constant 0 : i32
    return %c0_i32, %c0_i32_0 : i32, i32
  }
  func.func @transform_2(%arg0: i32) -> (i32, i32) {
    %c0_i32 = arith.constant 0 : i32
    %c0_i32_0 = arith.constant 0 : i32
    %c0_i32_1 = arith.constant 0 : i32
    return %c0_i32, %c0_i32_0 : i32, i32
  }
  func.func @transform_3(%arg0: i32) -> (i32, i32) {
    %c0_i32 = arith.constant 0 : i32
    %c0_i32_0 = arith.constant 0 : i32
    %c0_i32_1 = arith.constant 0 : i32
    return %c0_i32, %c0_i32_0 : i32, i32
  }
  func.func @transform_4(%arg0: i32) -> (i32, i32) {
    %c0_i32 = arith.constant 0 : i32
    %c0_i32_0 = arith.constant 0 : i32
    %c0_i32_1 = arith.constant 0 : i32
    return %c0_i32, %c0_i32_0 : i32, i32
  }
  func.func @transform_5(%arg0: i32) -> (i32, i32) {
    %c0_i32 = arith.constant 0 : i32
    %c0_i32_0 = arith.constant 0 : i32
    %c0_i32_1 = arith.constant 0 : i32
    return %c0_i32, %c0_i32_0 : i32, i32
  }
  func.func @transform_6(%arg0: i32) -> (i32, i32) {
    %c0_i32 = arith.constant 0 : i32
    %c0_i32_0 = arith.constant 0 : i32
    %c0_i32_1 = arith.constant 0 : i32
    return %c0_i32, %c0_i32_0 : i32, i32
  }
  func.func @transform_7(%arg0: i32) -> (i32, i32) {
    %c0_i32 = arith.constant 0 : i32
    %c0_i32_0 = arith.constant 0 : i32
    %c0_i32_1 = arith.constant 0 : i32
    return %c0_i32, %c0_i32_0 : i32, i32
  }
  func.func @transform_8(%arg0: i32) -> (i32, i32) {
    %c0_i32 = arith.constant 0 : i32
    %c0_i32_0 = arith.constant 0 : i32
    %c0_i32_1 = arith.constant 0 : i32
    return %c0_i32, %c0_i32_0 : i32, i32
  }
  func.func @transform_9(%arg0: i32) -> (i32, i32) {
    %c0_i32 = arith.constant 0 : i32
    %c0_i32_0 = arith.constant 0 : i32
    %c0_i32_1 = arith.constant 0 : i32
    return %c0_i32, %c0_i32_0 : i32, i32
  }
  func.func @transform_10(%arg0: i32) -> (i32, i32) {
    %c0_i32 = arith.constant 0 : i32
    %c0_i32_0 = arith.constant 0 : i32
    %c0_i32_1 = arith.constant 0 : i32
    return %c0_i32, %c0_i32_0 : i32, i32
  }
  func.func @transform_11(%arg0: i32) -> (i32, i32) {
    %c0_i32 = arith.constant 0 : i32
    %c0_i32_0 = arith.constant 0 : i32
    %c0_i32_1 = arith.constant 0 : i32
    return %c0_i32, %c0_i32_0 : i32, i32
  }
  func.func @transform_12(%arg0: i32) -> (i32, i32) {
    %c0_i32 = arith.constant 0 : i32
    %c0_i32_0 = arith.constant 0 : i32
    %c0_i32_1 = arith.constant 0 : i32
    return %c0_i32, %c0_i32_0 : i32, i32
  }
  func.func @transform_13(%arg0: i32) -> (i32, i32) {
    %c0_i32 = arith.constant 0 : i32
    %c0_i32_0 = arith.constant 0 : i32
    %c0_i32_1 = arith.constant 0 : i32
    return %c0_i32, %c0_i32_0 : i32, i32
  }
  func.func @transform_14(%arg0: i32) -> (i32, i32) {
    %c0_i32 = arith.constant 0 : i32
    %c0_i32_0 = arith.constant 0 : i32
    %c0_i32_1 = arith.constant 0 : i32
    return %c0_i32, %c0_i32_0 : i32, i32
  }
  func.func @transform_15(%arg0: i32) -> (i32, i32, i32) {
    %c0_i32 = arith.constant 0 : i32
    %c0_i32_0 = arith.constant 0 : i32
    %c0_i32_1 = arith.constant 0 : i32
    return %arg0, %c0_i32, %c0_i32_0 : i32, i32, i32
  }
}

</mosaic_0001>

<bundles_post_ra>
// kernel: grouped_hadamard_attention.1
= control target key start
LH: loop header
LB: loop body
LE: loop exit
PB: predicated region body
PF: predicated region fallthrough
CT: control target
= control target key end

     0   :  { %s1554_s18 = smov 0   ;;  %s1999_s0 = inlined_call_operand.vmem [shape: f32[2,8,256], index: 0, kind: input, shape index: {}]   ;;  %s2000_s1 = inlined_call_operand.vmem [shape: f32[8,256], index: 1, kind: input, shape index: {}]   ;;  %s2001_s2 = inlined_call_operand.vmem [shape: f32[8,256], index: 2, kind: input, shape index: {}]   ;;  %s2002_s3 = inlined_call_operand.vmem [shape: f32[8,1], index: 3, kind: input, shape index: {}]   ;;  %s2003_s4 = inlined_call_operand.vmem [shape: f32[8,1], index: 4, kind: input, shape index: {}]   ;;  %s2004_s5 = inlined_call_operand.vmem [shape: f32[8,8], index: 5, kind: input, shape index: {}]   ;;  %s2005_s6 = inlined_call_operand.vmem [shape: f32[8,1], index: 6, kind: input, shape index: {}]   ;;  %s2006_s7 = inlined_call_operand.vmem [shape: f32[8,9], index: 7, kind: input, shape index: {}]   ;;  %s2007_s8 = inlined_call_operand.vmem [shape: f32[8,1], index: 8, kind: input, shape index: {}]   ;;  %s2008_s9 = inlined_call_operand.vmem [shape: f32[8,1], index: 9, kind: input, shape index: {}]   ;;  %s2009_s10 = inlined_call_operand.vmem [shape: f32[8,1], index: 10, kind: input, shape index: {}]   ;;  %s2010_s11 = inlined_call_operand.vmem [shape: f32[8,9], index: 11, kind: input, shape index: {}]   ;;  %s2011_s12 = inlined_call_operand.vmem [shape: f32[8,1], index: 12, kind: input, shape index: {}]   ;;  %s2012_s13 = inlined_call_operand.vmem [shape: f32[8,8], index: 13, kind: input, shape index: {}]   ;;  %s2013_s14 = inlined_call_operand.vmem [shape: f32[8,1], index: 14, kind: input, shape index: {}]   ;;  %s2014_s15 = inlined_call_operand.vmem [shape: f32[2,8,256], index: 15, kind: output, shape index: {}]  }
   0x1 LB: > { %s1357_s19 = sadd.s32 4294967295, %s1455_s18   ;;  %p1361_p0 = scmp.ge.s32.totalorder %s1455_s18, 1  ;;  %s1455_s18 = sphi %s1554_s18, %s25_s18  }
   0x2   : > { %p437_p1 = scmp.lt.s32.totalorder %s1455_s18, 3 }
   0x4   : > { %p438_p2 = pnand %p1361_p0, %p437_p1 }
   0x5   : > { %p485_p3 = scmp.lt.s32.totalorder (!%p438_p2), %s1357_s19, 1  ;;  %s1466_s21 = smov (!%p438_p2), 17  }
   0x6   : > { %441 = sbr.rel (%p438_p2) target bundleno = 649 (0x289), region = 80  ;;  %s1468_s23 = smov (!%p438_p2), 15  }
   0x7   : > { %s1469_s24 = smov (!%p438_p2), 1   ;;  %s1470_s25 = smov (!%p438_p2), 127  }
   0x8   : > { %s1471_s26 = smov (!%p438_p2), 113   ;;  %s1472_s27 = smov (!%p438_p2), 112  }
   0x9   : > { %s1473_s28 = smov (!%p438_p2), 111  }
   0xb   : > { %v563_v0 = vld [vmem:[%s2004_s5] sm:$0xff]  ;;  %v1457_v2 = vmov 0   ;;  %v1458_v5 = vmov 2   ;;  %v1459_v6 = vmov 1   ;;  %v1460_v7 = vmov 3   ;;  %s2018_s19 = smov (!%p485_p3, %s1357_s19), 1 }
   0xc   : > { %v499_v1 = vld [vmem:[%s2002_s3] sm:$0xff]  ;;  %1396 = vset.pattern.permute.xlu1 %v1457_v2  ;;  %1395 = vset.pattern.permute.xlu0 %v1457_v2  ;;  %v1461_v8 = vmov 4   ;;  %v1462_v9 = vmov 5   ;;  %v1463_v10 = vmov 7   ;;  %v2015_v11 = vmov 6   ;;  %s1368_s17 = sshll.u32 %s2018_s19, 4 }
   0xd   : > { %567 = vperm.xlu1 %1396, %v563_v0   ;;  %547 = vperm.xlu0 %1395, %v499_v1   ;;  %v564_v3 = vld [vmem:[%s2005_s6] sm:$0xff]  ;;  %s489_s22 = scalar_lea.vmem %s1999_s0, %s1368_s17  ;;  %v1465_v54 = vmov 8   ;;  %v570_v62 = vlaneseq }
   0xe   : > { %v500_v4 = vld [vmem:[%s2003_s4] sm:$0xff]  ;;  %v496_v15 = vld [vmem:[%s489_s22 + $0x8] sm:$0xff] }
   0xf   : > { %v1586_v12 = vld [vmem:[%s2006_s7] sm:$0xff]  ;;  %v507_v18 = vrot.slane %v496_v15, 4  ;;  %v516_v19 = vmul.f32 %v496_v15, %v496_v15 }
  0x10   : > { %v725_v13 = vld [vmem:[%s2007_s8] sm:$0xff] }
  0x11   : > { %582 = vperm.xlu1 %1396, %v564_v3   ;;  %554 = vperm.xlu0 %1395, %v500_v4   ;;  %v495_v14 = vld [vmem:[%s489_s22] sm:$0xff]  ;;  %v508_v22 = vadd.f32 %v507_v18, %v496_v15  ;;  %v523_v23 = vrot.slane %v516_v19, 4  ;;  %s1467_s22 = smov 16  }
  0x12   : > { %v501_v16 = vrot.slane %v495_v14, 4  ;;  %v515_v17 = vmul.f32 %v495_v14, %v495_v14  ;;  %v942_v59 = vld [vmem:[%s2008_s9] sm:$0xff] }
  0x13   : > { %v509_v26 = vrot.slane %v508_v22, 2  ;;  %v524_v27 = vadd.f32 %v523_v23, %v516_v19  ;;  %v1003_v63 = vld [vmem:[%s2011_s12] sm:$0xff] }
  0x14   : > { %v502_v20 = vadd.f32 %v501_v16, %v495_v14  ;;  %v517_v21 = vrot.slane %v515_v17, 4 }
  0x15   : > { %1398 = vset.pattern.permute.xlu1 %v1458_v5  ;;  %1397 = vset.pattern.permute.xlu0 %v1459_v6  ;;  %v510_v30 = vadd.f32 %v509_v26, %v508_v22  ;;  %v525_v31 = vrot.slane %v524_v27, 2 }
  0x16   : > { %604 = vperm.xlu1 %1398, %v563_v0   ;;  %588 = vperm.xlu0 %1397, %v563_v0   ;;  %v503_v24 = vrot.slane %v502_v20, 2  ;;  %v518_v25 = vadd.f32 %v517_v21, %v515_v17 }
  0x17   : > { %v511_v34 = vrot.slane %v510_v30, 1  ;;  %v526_v35 = vadd.f32 %v525_v31, %v524_v27 }
  0x18   : > { %v504_v28 = vadd.f32 %v503_v24, %v502_v20  ;;  %v519_v29 = vrot.slane %v518_v25, 2  ;;  %v1644_v20 = vld [vmem:[%s2010_s11] sm:$0xff] }
  0x19   : > { %v512_v38 = vadd.f32 %v511_v34, %v510_v30  ;;  %v527_v39 = vrot.slane %v526_v35, 1 }
  0x1a   : > { %1399 = vset.pattern.permute.xlu1 %v1460_v7  ;;  %1400 = vset.pattern.permute.xlu0 %v1461_v8  ;;  %v505_v32 = vrot.slane %v504_v28, 1  ;;  %v520_v33 = vadd.f32 %v519_v29, %v518_v25 }
  0x1b   : > { %620 = vperm.xlu1 %1399, %v563_v0   ;;  %636 = vperm.xlu0 %1400, %v563_v0   ;;  %v514_v42 = vmul.f32 0.125, %v512_v38  ;;  %v528_v43 = vadd.f32 %v527_v39, %v526_v35 }
  0x1c   : > { %v506_v36 = vadd.f32 %v505_v32, %v504_v28  ;;  %v521_v37 = vrot.slane %v520_v33, 1 }
  0x1d   : > { %v530_v46 = vmul.f32 0.125, %v528_v43  ;;  %v532_v47 = vmul.f32 %v514_v42, %v514_v42  ;;  %v538_v57 = vsub.f32 %v496_v15, %v514_v42  ;;  %v560_v15 = vld [vmem:[%s2000_s1 + $0x8] sm:$0xff] }
  0x1e   : > { %v513_v40 = vmul.f32 0.125, %v506_v36  ;;  %v522_v41 = vadd.f32 %v521_v37, %v520_v33 }
  0x1f   : > { %1401 = vset.pattern.permute.xlu1 %v1462_v9  ;;  %1403 = vset.pattern.permute.xlu0 %v1463_v10  ;;  %v534_v49 = vsub.f32 %v530_v46, %v532_v47 }
  0x20   : > { %652 = vperm.xlu1 %1401, %v563_v0   ;;  %684 = vperm.xlu0 %1403, %v563_v0   ;;  %v529_v44 = vmul.f32 0.125, %v522_v41  ;;  %v531_v45 = vmul.f32 %v513_v40, %v513_v40  ;;  %v537_v56 = vsub.f32 %v495_v14, %v513_v40  ;;  %v559_v14 = vld [vmem:[%s2000_s1] sm:$0xff] }
  0x21   : > { %v536_v51 = vmax.f32 %v534_v49, 0.0 }
  0x22   : > { %v533_v48 = vsub.f32 %v529_v44, %v531_v45 }
  0x23   : > { %v540_v53 = vadd.f32 1e-06, %v536_v51 }
  0x24   : > { %1402 = vset.pattern.permute.xlu1 %v2015_v11  ;;  %1406 = vset.pattern.permute.xlu0 %v1457_v2  ;;  %v535_v50 = vmax.f32 %v533_v48, 0.0 }
  0x25   : > { %668 = vperm.xlu1 %1402, %v563_v0   ;;  %760 = vperm.xlu0 %1406, %v1586_v12  }
  0x26   : > { %v539_v52 = vadd.f32 1e-06, %v535_v50 }
  0x28   : > { %1433 = vrsqrt.f32 %v539_v52 }
  0x29   : > { %1404 = vset.pattern.permute.xlu1 %v1461_v8  ;;  %1407 = vset.pattern.permute.xlu0 %v1459_v6  ;;  %1435 = vrsqrt.f32 %v540_v53 }
  0x2a   : > { %728 = vperm.xlu1 %1404, %v1586_v12   ;;  %785 = vperm.xlu0 %1407, %v1586_v12  }
  0x2e   : > { %1405 = vset.pattern.permute.xlu1 %v1457_v2  ;;  %1408 = vset.pattern.permute.xlu0 %v1458_v5 }
  0x2f   : > { %735 = vperm.xlu1 %1405, %v725_v13   ;;  %810 = vperm.xlu0 %1408, %v1586_v12  }
  0x33   : > { %1409 = vset.pattern.permute.xlu0 %v1460_v7 }
  0x34   : > { %835 = vperm.xlu0 %1409, %v1586_v12  }
  0x35   : > { %v1434_v55 = vpop.eup %1433 }
  0x36   : > { %v1436_v58 = vpop.eup %1435  ;;  %v543_v60 = vmul.f32 %v1434_v55, %v537_v56 }
  0x37   : > { %v544_v61 = vmul.f32 %v1436_v58, %v538_v57 }
  0x38   : > { %1410 = vset.pattern.permute.xlu0 %v1462_v9 }
  0x39   : > { %860 = vperm.xlu0 %1410, %v1586_v12  }
  0x3d   : > { %1411 = vset.pattern.permute.xlu0 %v2015_v11 }
  0x3e   : > { %885 = vperm.xlu0 %1411, %v1586_v12  }
  0x42   : > { %1412 = vset.pattern.permute.xlu0 %v1463_v10 }
  0x43   : > { %910 = vperm.xlu0 %1412, %v1586_v12  }
  0x47   : > { %1413 = vset.pattern.permute.xlu0 %v1465_v54 }
  0x48   : > { %935 = vperm.xlu0 %1413, %v1586_v12   ;;  %v1630_v12 = vshrl.u32 %v570_v62, 7 }
  0x4a   : > { %v1639_v19 = vsub.s32 0, %v1630_v12  ;;  %v1648_v21 = vsub.s32 1, %v1630_v12  ;;  %v1656_v24 = vsub.s32 2, %v1630_v12  ;;  %v1667_v31 = vsub.s32 3, %v1630_v12 }
  0x4b   : > { %v1676_v36 = vsub.s32 4, %v1630_v12  ;;  %v1683_v44 = vsub.s32 5, %v1630_v12  ;;  %vm701_vm0 = vcmp.ge.s32.totalorder %v1630_v12, 6 }
  0x4c   : > { %1414 = vset.pattern.permute.xlu0 %v1457_v2 }
  0x4d   : > { %990 = vperm.xlu0 %1414, %v942_v59   ;;  %v1696_v59 = vsub.s32 6, %v1630_v12 }
  0x51   : > { %1013 = vperm.xlu0 %1414, %v1003_v63  }
  0x55   : > { %1417 = vset.pattern.permute.xlu0 %v1459_v6 }
  0x56   : > { %1043 = vperm.xlu0 %1417, %v1644_v20  }
  0x5a   : > { %1418 = vset.pattern.permute.xlu0 %v1458_v5 }
  0x5b   : > { %1059 = vperm.xlu0 %1418, %v1644_v20  }
  0x5f   : > { %1419 = vset.pattern.permute.xlu0 %v1460_v7 }
  0x60   : > { %1075 = vperm.xlu0 %1419, %v1644_v20  }
  0x64   : > { %1420 = vset.pattern.permute.xlu0 %v1462_v9 }
  0x65   : > { %1091 = vperm.xlu0 %1420, %v1644_v20  }
  0x69   : > { %1421 = vset.pattern.permute.xlu0 %v2015_v11 }
  0x6a   : > { %1107 = vperm.xlu0 %1421, %v1644_v20  }
  0x6e   : > { %1422 = vset.pattern.permute.xlu0 %v1463_v10 }
  0x88   : > { %v568_v0 = vpop.permute.xlu1 %567  ;;  %v548_v1 = vpop.permute.xlu0 %547 }
  0x89   : > { %v550_v3 = vmul.f32 %v548_v1, %v543_v60  ;;  %v551_v4 = vmul.f32 %v548_v1, %v544_v61 }
  0x8c   : > { %v583_v13 = vpop.permute.xlu1 %582  ;;  %v555_v16 = vpop.permute.xlu0 %554 }
  0x8d   : > { %v557_v17 = vadd.f32 %v555_v16, %v550_v3  ;;  %v558_v18 = vadd.f32 %v555_v16, %v551_v4  ;;  %v1699_v3 = vsub.s32 7, %v1630_v12  ;;  %v943_v12 = vld [vmem:[%s2009_s10] sm:$0xff] }
  0x8f   : > { %v1651_v22 = vmul.f32 %v559_v14, %v557_v17  ;;  %v1653_v23 = vmul.f32 %v560_v15, %v558_v18 }
  0x91   : > { %v605_v25 = vpop.permute.xlu1 %604  ;;  %v573_v26 = vrot.slane %v1651_v22, %v1639_v19  ;;  %v577_v27 = vrot.slane %v1653_v23, %v1639_v19  ;;  %v589_v28 = vpop.permute.xlu0 %588  ;;  %v594_v29 = vrot.slane %v1651_v22, %v1648_v21  ;;  %v598_v30 = vrot.slane %v1653_v23, %v1648_v21 }
  0x92   : > { %v610_v32 = vrot.slane %v1651_v22, %v1656_v24  ;;  %v614_v33 = vrot.slane %v1653_v23, %v1656_v24  ;;  %v626_v42 = vrot.slane %v1651_v22, %v1667_v31  ;;  %v630_v43 = vrot.slane %v1653_v23, %v1667_v31 }
  0x93   : > { %v578_v34 = vmul.f32 %v573_v26, %v568_v0  ;;  %v579_v35 = vmul.f32 %v577_v27, %v568_v0  ;;  %v599_v39 = vmul.f32 %v594_v29, %v589_v28  ;;  %v600_v40 = vmul.f32 %v598_v30, %v589_v28 }
  0x94   : > { %v615_v45 = vmul.f32 %v610_v32, %v605_v25  ;;  %v616_v46 = vmul.f32 %v614_v33, %v605_v25  ;;  %v642_v50 = vrot.slane %v1651_v22, %v1676_v36  ;;  %v646_v51 = vrot.slane %v1653_v23, %v1676_v36 }
  0x95   : > { %v585_v37 = vadd.f32 %v583_v13, %v578_v34  ;;  %v586_v38 = vadd.f32 %v583_v13, %v579_v35  ;;  %v658_v57 = vrot.slane %v1651_v22, %v1683_v44  ;;  %v662_v58 = vrot.slane %v1653_v23, %v1683_v44 }
  0x96   : > { %v621_v41 = vpop.permute.xlu1 %620  ;;  %v637_v49 = vpop.permute.xlu0 %636  ;;  %v674_v16 = vrot.slane %v1651_v22, %v1696_v59  ;;  %v678_v17 = vrot.slane %v1653_v23, %v1696_v59  ;;  %v690_v25 = vrot.slane %v1651_v22, %v1699_v3  ;;  %v694_v26 = vrot.slane %v1653_v23, %v1699_v3 }
  0x97   : > { %v601_v47 = vadd.f32 %v599_v39, %v585_v37  ;;  %v602_v48 = vadd.f32 %v600_v40, %v586_v38  ;;  %v631_v55 = vmul.f32 %v626_v42, %v621_v41  ;;  %v632_v56 = vmul.f32 %v630_v43, %v621_v41 }
  0x98   : > { %v647_v63 = vmul.f32 %v642_v50, %v637_v49  ;;  %v648_v0 = vmul.f32 %v646_v51, %v637_v49 }
  0x99   : > { %v617_v52 = vadd.f32 %v615_v45, %v601_v47  ;;  %v618_v53 = vadd.f32 %v616_v46, %v602_v48 }
  0x9b   : > { %v633_v60 = vadd.f32 %v631_v55, %v617_v52  ;;  %v634_v61 = vadd.f32 %v632_v56, %v618_v53  ;;  %v653_v1 = vpop.permute.xlu1 %652  ;;  %v685_v18 = vpop.permute.xlu0 %684 }
  0x9c   : > { %v663_v14 = vmul.f32 %v658_v57, %v653_v1  ;;  %v664_v15 = vmul.f32 %v662_v58, %v653_v1  ;;  %v695_v33 = vmul.f32 %v690_v25, %v685_v18  ;;  %v696_v34 = vmul.f32 %v694_v26, %v685_v18 }
  0x9d   : > { %v649_v4 = vadd.f32 %v647_v63, %v633_v60  ;;  %v650_v13 = vadd.f32 %v648_v0, %v634_v61  ;;  %v1739_v18 = vand.u32 127, %v570_v62 }
  0x9f   : > { %v665_v28 = vadd.f32 %v663_v14, %v649_v4  ;;  %v666_v29 = vadd.f32 %v664_v15, %v650_v13  ;;  %vm746_vm1 = vcmp.lt.s32.totalorder %v1739_v18, 17  ;;  %vm771_vm2 = vcmp.lt.s32.totalorder %v1739_v18, 16 }
  0xa0   : > { %v669_v27 = vpop.permute.xlu1 %668  ;;  %v761_v26 = vpop.permute.xlu0 %760  ;;  %vm796_vm3 = vcmp.lt.s32.totalorder %v1739_v18, 15  ;;  %vm821_vm4 = vcmp.lt.s32.totalorder %v1739_v18, 1  ;;  %vm846_vm5 = vcmp.lt.s32.totalorder %v1739_v18, 127  ;;  %vm871_vm6 = vcmp.lt.s32.totalorder %v1739_v18, 113 }
  0xa1   : > { %v679_v30 = vmul.f32 %v674_v16, %v669_v27  ;;  %v680_v32 = vmul.f32 %v678_v17, %v669_v27  ;;  %v1744_v27 = vld [vmem:[%s2001_s2] sm:$0xff]  ;;  %vm896_vm7 = vcmp.lt.s32.totalorder %v1739_v18, 112  ;;  %vm921_vm8 = vcmp.lt.s32.totalorder %v1739_v18, 111 }
  0xa2   : > { %v1754_v62 = vrot.slane %v1744_v27, %v1639_v19 }
  0xa3   : > { %v681_v35 = vadd.f32 %v679_v30, %v665_v28  ;;  %v682_v37 = vadd.f32 %v680_v32, %v666_v29  ;;  %v1749_v28 = vld [vmem:[%s2001_s2 + $0x8] sm:$0xff] }
  0xa4   : > { %v1758_v32 = vrot.slane %v1749_v28, %v1639_v19 }
  0xa5   : > { %v697_v38 = vadd.f32 %v695_v33, %v681_v35  ;;  %v698_v39 = vadd.f32 %v696_v34, %v682_v37  ;;  %v729_v61 = vpop.permute.xlu1 %728  ;;  %v786_v30 = vpop.permute.xlu0 %785 }
  0xa7   : > { %v704_v22 = vmul.f32 0.044715, %v697_v38  ;;  %v705_v40 = vmul.f32 0.044715, %v698_v39  ;;  %v702_v51 = vmul.f32 0.5, %v697_v38  ;;  %v703_v55 = vmul.f32 0.5, %v698_v39 }
  0xa9   : > { %v706_v23 = vmul.f32 %v704_v22, %v697_v38  ;;  %v707_v41 = vmul.f32 %v705_v40, %v698_v39  ;;  %v1771_v22 = vrot.slane %v1749_v28, %v1648_v21 }
  0xaa   : > { %v736_v63 = vpop.permute.xlu1 %735  ;;  %v811_v40 = vpop.permute.xlu0 %810 }
  0xab   : > { %v708_v42 = vmul.f32 %v706_v23, %v697_v38  ;;  %v709_v43 = vmul.f32 %v707_v41, %v698_v39 }
  0xad   : > { %v710_v45 = vadd.f32 %v708_v42, %v697_v38  ;;  %v711_v46 = vadd.f32 %v709_v43, %v698_v39 }
  0xaf   : > { %v712_v47 = vmul.f32 0.7978846, %v710_v45  ;;  %v713_v48 = vmul.f32 0.7978846, %v711_v46 }
  0xb1   : > { %1437 = vtanh.f32 %v712_v47  ;;  %v1782_v47 = vrot.slane %v1744_v27, %v1656_v24 }
  0xb2   : > { %1439 = vtanh.f32 %v713_v48  ;;  %v1786_v48 = vrot.slane %v1749_v28, %v1656_v24 }
  0xbe   : > { %v1438_v49 = vpop.eup %1437 }
  0xbf   : > { %v1440_v50 = vpop.eup %1439  ;;  %v716_v52 = vadd.f32 1.0, %v1438_v49 }
  0xc0   : > { %v717_v53 = vadd.f32 1.0, %v1440_v50 }
  0xc1   : > { %v718_v56 = vmul.f32 %v716_v52, %v702_v51  ;;  %v1795_v51 = vrot.slane %v1744_v27, %v1667_v31 }
  0xc2   : > { %v719_v57 = vmul.f32 %v717_v53, %v703_v55 }
  0xc3   : > { %v722_v58 = vsel %vm701_vm0, %v718_v56, %v697_v38  ;;  %v1801_v56 = vrot.slane %v1749_v28, %v1667_v31 }
  0xc4   : > { %740 = vrot.lane.b32.xlu1 %v722_v58, %s1466_s21  ;;  %v723_v60 = vsel %vm701_vm0, %v719_v57, %v698_v39  ;;  %v731_v33 = vmul.f32 %v729_v61, %v722_v58  ;;  %v1767_v39 = vrot.slane %v1744_v27, %v1648_v21  ;;  %v836_v57 = vpop.permute.xlu0 %835 }
  0xc5   : > { %v732_v34 = vmul.f32 %v729_v61, %v723_v60  ;;  %v1810_v61 = vrot.slane %v1749_v28, %v1676_v36 }
  0xc6   : > { %v738_v45 = vadd.f32 %v736_v63, %v731_v33 }
  0xc7   : > { %v739_v46 = vadd.f32 %v736_v63, %v732_v34 }
  0xc8   : > { %742 = vrot.lane.b32.xlu1 %v723_v60, %s1466_s21 }
  0xcc   : > { %767 = vrot.lane.b32.xlu1 %v722_v58, %s1467_s22 }
  0xd0   : > { %769 = vrot.lane.b32.xlu1 %v723_v60, %s1467_s22 }
  0xd4   : > { %792 = vrot.lane.b32.xlu1 %v722_v58, %s1468_s23 }
  0xd8   : > { %794 = vrot.lane.b32.xlu1 %v723_v60, %s1468_s23 }
  0xdc   : > { %817 = vrot.lane.b32.xlu1 %v722_v58, %s1469_s24 }
  0xe0   : > { %819 = vrot.lane.b32.xlu1 %v723_v60, %s1469_s24 }
  0xe4   : > { %842 = vrot.lane.b32.xlu1 %v722_v58, %s1470_s25 }
  0xe8   : > { %844 = vrot.lane.b32.xlu1 %v723_v60, %s1470_s25 }
  0xec   : > { %867 = vrot.lane.b32.xlu1 %v722_v58, %s1471_s26 }
  0xf0   : > { %869 = vrot.lane.b32.xlu1 %v723_v60, %s1471_s26 }
  0xf4   : > { %892 = vrot.lane.b32.xlu1 %v722_v58, %s1472_s27 }
  0xf8   : > { %894 = vrot.lane.b32.xlu1 %v723_v60, %s1472_s27 }
  0xfc   : > { %917 = vrot.lane.b32.xlu1 %v722_v58, %s1473_s28 }
 0x100   : > { %919 = vrot.lane.b32.xlu1 %v723_v60, %s1473_s28 }
 0x104   : > { %997 = vperm.xlu1 %1405, %v943_v12   ;;  %v1806_v12 = vrot.slane %v1744_v27, %v1676_v36 }
 0x108   : > { %1415 = vset.pattern.permute.xlu1 %v1461_v8 }
 0x109   : > { %1006 = vperm.xlu1 %1415, %v1644_v20  }
 0x10d   : > { %1416 = vset.pattern.permute.xlu1 %v1457_v2 }
 0x10e   : > { %1027 = vperm.xlu1 %1416, %v1644_v20  }
 0x136   : > { %v741_v0 = vpop.permute.xlu1 %740 }
 0x13a   : > { %v743_v1 = vpop.permute.xlu1 %742 }
 0x13b   : > { %v747_v35 = vsel %vm746_vm1, %v741_v0, %v743_v1  ;;  %v748_v37 = vsel %vm746_vm1, %v743_v1, %v741_v0 }
 0x13c   : > { %v757_v23 = vmul.f32 %v1754_v62, %v748_v37  ;;  %v758_v41 = vmul.f32 %v1758_v32, %v747_v35 }
 0x13e   : > { %v768_v4 = vpop.permute.xlu1 %767  ;;  %v763_v58 = vmul.f32 %v761_v26, %v757_v23  ;;  %v764_v60 = vmul.f32 %v761_v26, %v758_v41 }
 0x140   : > { %v765_v35 = vadd.f32 %v763_v58, %v738_v45  ;;  %v766_v37 = vadd.f32 %v764_v60, %v739_v46 }
 0x142   : > { %v770_v13 = vpop.permute.xlu1 %769 }
 0x143   : > { %v772_v42 = vsel %vm771_vm2, %v768_v4, %v770_v13  ;;  %v773_v43 = vsel %vm771_vm2, %v770_v13, %v768_v4  ;;  %v1821_v13 = vrot.slane %v1744_v27, %v1683_v44 }
 0x144   : > { %v782_v53 = vmul.f32 %v1767_v39, %v773_v43  ;;  %v783_v55 = vmul.f32 %v1771_v22, %v772_v42 }
 0x146   : > { %v793_v14 = vpop.permute.xlu1 %792  ;;  %v788_v26 = vmul.f32 %v786_v30, %v782_v53  ;;  %v789_v33 = vmul.f32 %v786_v30, %v783_v55 }
 0x148   : > { %v791_v46 = vadd.f32 %v789_v33, %v766_v37 }
 0x14a   : > { %v795_v15 = vpop.permute.xlu1 %794 }
 0x14b   : > { %v797_v49 = vsel %vm796_vm3, %v793_v14, %v795_v15  ;;  %v798_v50 = vsel %vm796_vm3, %v795_v15, %v793_v14  ;;  %v1825_v14 = vrot.slane %v1749_v28, %v1683_v44 }
 0x14c   : > { %v807_v63 = vmul.f32 %v1782_v47, %v798_v50  ;;  %v808_v0 = vmul.f32 %v1786_v48, %v797_v49 }
 0x14e   : > { %v818_v16 = vpop.permute.xlu1 %817  ;;  %v813_v42 = vmul.f32 %v811_v40, %v807_v63  ;;  %v814_v43 = vmul.f32 %v811_v40, %v808_v0  ;;  %v790_v40 = vadd.f32 %v788_v26, %v765_v35 }
 0x152   : > { %v820_v17 = vpop.permute.xlu1 %819 }
 0x153   : > { %v822_v1 = vsel %vm821_vm4, %v818_v16, %v820_v17  ;;  %v823_v4 = vsel %vm821_vm4, %v820_v17, %v818_v16  ;;  %v861_v17 = vpop.permute.xlu0 %860 }
 0x154   : > { %v832_v23 = vmul.f32 %v1795_v51, %v823_v4  ;;  %v833_v41 = vmul.f32 %v1801_v56, %v822_v1  ;;  %v815_v1 = vadd.f32 %v813_v42, %v790_v40  ;;  %v816_v4 = vadd.f32 %v814_v43, %v791_v46 }
 0x156   : > { %v843_v25 = vpop.permute.xlu1 %842  ;;  %v839_v60 = vmul.f32 %v836_v57, %v833_v41 }
 0x157   : > { %v886_v55 = vpop.permute.xlu0 %885 }
 0x158   : > { %v841_v41 = vadd.f32 %v839_v60, %v816_v4 }
 0x15a   : > { %v845_v29 = vpop.permute.xlu1 %844 }
 0x15b   : > { %v847_v34 = vsel %vm846_vm5, %v843_v25, %v845_v29  ;;  %v848_v16 = vsel %vm846_vm5, %v845_v29, %v843_v25  ;;  %v1842_v25 = vrot.slane %v1744_v27, %v1696_v59  ;;  %v1846_v29 = vrot.slane %v1749_v28, %v1696_v59  ;;  %v911_v37 = vpop.permute.xlu0 %910 }
 0x15c   : > { %v857_v50 = vmul.f32 %v1806_v12, %v847_v34  ;;  %v858_v53 = vmul.f32 %v1810_v61, %v848_v16 }
 0x15e   : > { %v868_v38 = vpop.permute.xlu1 %867  ;;  %v863_v34 = vmul.f32 %v861_v17, %v857_v50  ;;  %v864_v16 = vmul.f32 %v861_v17, %v858_v53 }
 0x15f   : > { %v936_v40 = vpop.permute.xlu0 %935 }
 0x162   : > { %v870_v52 = vpop.permute.xlu1 %869 }
 0x163   : > { %v872_v49 = vsel %vm871_vm6, %v868_v38, %v870_v52  ;;  %v873_v30 = vsel %vm871_vm6, %v870_v52, %v868_v38  ;;  %v838_v52 = vmul.f32 %v836_v57, %v832_v23  ;;  %v1863_v57 = vrot.slane %v1749_v28, %v1699_v3 }
 0x164   : > { %v882_v63 = vmul.f32 %v1821_v13, %v872_v49  ;;  %v883_v0 = vmul.f32 %v1825_v14, %v873_v30  ;;  %v866_v49 = vadd.f32 %v864_v16, %v841_v41 }
 0x165   : > { %v840_v23 = vadd.f32 %v838_v52, %v815_v1 }
 0x166   : > { %v893_v15 = vpop.permute.xlu1 %892  ;;  %v888_v42 = vmul.f32 %v886_v55, %v882_v63  ;;  %v889_v17 = vmul.f32 %v886_v55, %v883_v0 }
 0x167   : > { %v865_v43 = vadd.f32 %v863_v34, %v840_v23 }
 0x169   : > { %v890_v46 = vadd.f32 %v888_v42, %v865_v43 }
 0x16a   : > { %v895_v45 = vpop.permute.xlu1 %894 }
 0x16b   : > { %v897_v58 = vsel %vm896_vm7, %v893_v15, %v895_v45  ;;  %v898_v38 = vsel %vm896_vm7, %v895_v45, %v893_v15  ;;  %v1859_v15 = vrot.slane %v1744_v27, %v1699_v3 }
 0x16c   : > { %v907_v26 = vmul.f32 %v1842_v25, %v897_v58  ;;  %v908_v33 = vmul.f32 %v1846_v29, %v898_v38  ;;  %v891_v58 = vadd.f32 %v889_v17, %v866_v49 }
 0x16e   : > { %v918_v35 = vpop.permute.xlu1 %917  ;;  %v913_v30 = vmul.f32 %v911_v37, %v907_v26  ;;  %v914_v50 = vmul.f32 %v911_v37, %v908_v33 }
 0x170   : > { %v915_v52 = vadd.f32 %v913_v30, %v890_v46  ;;  %v916_v55 = vadd.f32 %v914_v50, %v891_v58 }
 0x172   : > { %v920_v53 = vpop.permute.xlu1 %919 }
 0x173   : > { %v922_v45 = vsel %vm921_vm8, %v918_v35, %v920_v53  ;;  %v923_v27 = vsel %vm921_vm8, %v920_v53, %v918_v35 }
 0x174   : > { %v932_v28 = vmul.f32 %v1859_v15, %v922_v45  ;;  %v933_v38 = vmul.f32 %v1863_v57, %v923_v27 }
 0x176   : > { %v938_v60 = vmul.f32 %v936_v40, %v932_v28  ;;  %v939_v63 = vmul.f32 %v936_v40, %v933_v38 }
 0x178   : > { %v940_v0 = vadd.f32 %v938_v60, %v915_v52  ;;  %v941_v1 = vadd.f32 %v939_v63, %v916_v55 }
 0x17a   : > { %v944_v4 = vrot.slane %v940_v0, 4  ;;  %v950_v34 = vrot.slane %v941_v1, 4  ;;  %v958_v16 = vmul.f32 %v940_v0, %v940_v0  ;;  %v959_v26 = vmul.f32 %v941_v1, %v941_v1 }
 0x17c   : > { %v945_v33 = vadd.f32 %v944_v4, %v940_v0  ;;  %v951_v37 = vadd.f32 %v950_v34, %v941_v1  ;;  %v960_v35 = vrot.slane %v958_v16, 4  ;;  %v966_v23 = vrot.slane %v959_v26, 4 }
 0x17e   : > { %v961_v41 = vadd.f32 %v960_v35, %v958_v16  ;;  %v967_v42 = vadd.f32 %v966_v23, %v959_v26  ;;  %v946_v17 = vrot.slane %v945_v33, 2  ;;  %v952_v43 = vrot.slane %v951_v37, 2 }
 0x180   : > { %v962_v49 = vrot.slane %v961_v41, 2  ;;  %v968_v53 = vrot.slane %v967_v42, 2  ;;  %v947_v30 = vadd.f32 %v946_v17, %v945_v33  ;;  %v953_v50 = vadd.f32 %v952_v43, %v951_v37 }
 0x182   : > { %v963_v45 = vadd.f32 %v962_v49, %v961_v41  ;;  %v969_v27 = vadd.f32 %v968_v53, %v967_v42  ;;  %v948_v40 = vrot.slane %v947_v30, 1  ;;  %v954_v46 = vrot.slane %v953_v50, 1 }
 0x184   : > { %v949_v58 = vadd.f32 %v948_v40, %v947_v30  ;;  %v955_v28 = vadd.f32 %v954_v46, %v953_v50  ;;  %v964_v38 = vrot.slane %v963_v45, 1  ;;  %v970_v52 = vrot.slane %v969_v27, 1  ;;  %v991_v50 = vpop.permute.xlu0 %990  ;;  %v998_v40 = vpop.permute.xlu1 %997 }
 0x186   : > { %v956_v55 = vmul.f32 0.125, %v949_v58  ;;  %v957_v60 = vmul.f32 0.125, %v955_v28  ;;  %v965_v63 = vadd.f32 %v964_v38, %v963_v45  ;;  %v971_v4 = vadd.f32 %v970_v52, %v969_v27 }
 0x188   : > { %v972_v34 = vmul.f32 0.125, %v965_v63  ;;  %v973_v16 = vmul.f32 0.125, %v971_v4  ;;  %v974_v26 = vmul.f32 %v956_v55, %v956_v55  ;;  %v975_v35 = vmul.f32 %v957_v60, %v957_v60 }
 0x189   : > { %v980_v17 = vsub.f32 %v940_v0, %v956_v55  ;;  %v981_v49 = vsub.f32 %v941_v1, %v957_v60 }
 0x18a   : > { %v976_v23 = vsub.f32 %v972_v34, %v974_v26  ;;  %v977_v11 = vsub.f32 %v973_v16, %v975_v35 }
 0x18c   : > { %v978_v33 = vmax.f32 %v976_v23, 0.0  ;;  %v979_v37 = vmax.f32 %v977_v11, 0.0  ;;  %v1164_v11 = vld [vmem:[%s2012_s13] sm:$0xff] }
 0x18e   : > { %v982_v41 = vadd.f32 1e-06, %v978_v33  ;;  %v983_v42 = vadd.f32 1e-06, %v979_v37 }
 0x190   : > { %1441 = vrsqrt.f32 %v982_v41 }
 0x191   : > { %1443 = vrsqrt.f32 %v983_v42 }
 0x19d   : > { %v1442_v43 = vpop.eup %1441 }
 0x19e   : > { %v1444_v53 = vpop.eup %1443  ;;  %v986_v30 = vmul.f32 %v1442_v43, %v980_v17 }
 0x19f   : > { %v987_v45 = vmul.f32 %v1444_v53, %v981_v49 }
 0x1a0   : > { %v993_v27 = vmul.f32 %v991_v50, %v986_v30 }
 0x1a1   : > { %v994_v46 = vmul.f32 %v991_v50, %v987_v45 }
 0x1a2   : > { %v1871_v58 = vadd.f32 %v998_v40, %v993_v27 }
 0x1a3   : > { %v1873_v28 = vadd.f32 %v998_v40, %v994_v46 }
 0x1a4   : > { %1018 = vrot.lane.b32.xlu0 %v1871_v58, %s1466_s21 }
 0x1a5   : > { %1020 = vrot.lane.b32.xlu1 %v1873_v28, %s1466_s21 }
 0x1a8   : > { %1123 = vperm.xlu0 %1422, %v1644_v20  }
 0x1a9   : > { %1034 = vrot.lane.b32.xlu1 %v1871_v58, %s1467_s22 }
 0x1ac   : > { %1423 = vset.pattern.permute.xlu0 %v1465_v54 }
 0x1ad   : > { %1036 = vrot.lane.b32.xlu1 %v1873_v28, %s1467_s22  ;;  %1139 = vperm.xlu0 %1423, %v1644_v20   ;;  %v1014_v20 = vpop.permute.xlu0 %1013 }
 0x1b1   : > { %1050 = vrot.lane.b32.xlu1 %v1871_v58, %s1468_s23  ;;  %1424 = vset.pattern.permute.xlu0 %v1457_v2  ;;  %v1165_v2 = vld [vmem:[%s2013_s14] sm:$0xff]  ;;  %v1044_v1 = vpop.permute.xlu0 %1043 }
 0x1b2   : > { %1168 = vperm.xlu0 %1424, %v1164_v11  }
 0x1b5   : > { %1052 = vrot.lane.b32.xlu1 %v1873_v28, %s1468_s23 }
 0x1b6   : > { %1426 = vset.pattern.permute.xlu0 %v1458_v5  ;;  %v2016_v5 = vmov 6  }
 0x1b7   : > { %1205 = vperm.xlu0 %1426, %v1164_v11  }
 0x1b9   : > { %1066 = vrot.lane.b32.xlu1 %v1871_v58, %s1469_s24 }
 0x1bb   : > { %1429 = vset.pattern.permute.xlu0 %v1462_v9  ;;  %v1007_v9 = vpop.permute.xlu1 %1006 }
 0x1bc   : > { %1253 = vperm.xlu0 %1429, %v1164_v11   ;;  %v1009_v43 = vmul.f32 %v1007_v9, %v1871_v58  ;;  %v1010_v49 = vmul.f32 %v1007_v9, %v1873_v28 }
 0x1bd   : > { %1068 = vrot.lane.b32.xlu1 %v1873_v28, %s1469_s24 }
 0x1bf   : > { %v1028_v54 = vpop.permute.xlu1 %1027 }
 0x1c0   : > { %1432 = vset.pattern.permute.xlu0 %v1463_v10 }
 0x1c1   : > { %1082 = vrot.lane.b32.xlu1 %v1871_v58, %s1470_s25 }
 0x1c5   : > { %1084 = vrot.lane.b32.xlu1 %v1873_v28, %s1470_s25  ;;  %s494_s25 = scalar_lea.vmem %s2014_s15, %s1368_s17 }
 0x1c9   : > { %1098 = vrot.lane.b32.xlu1 %v1871_v58, %s1471_s26 }
 0x1cd   : > { %1100 = vrot.lane.b32.xlu1 %v1873_v28, %s1471_s26 }
 0x1d1   : > { %1114 = vrot.lane.b32.xlu1 %v1871_v58, %s1472_s27 }
 0x1d5   : > { %1116 = vrot.lane.b32.xlu1 %v1873_v28, %s1472_s27 }
 0x1d9   : > { %1130 = vrot.lane.b32.xlu1 %v1871_v58, %s1473_s28 }
 0x1dd   : > { %1132 = vrot.lane.b32.xlu1 %v1873_v28, %s1473_s28 }
 0x1e1   : > { %1183 = vperm.xlu1 %1416, %v1165_v2   ;;  %v1017_v2 = vadd.f32 %v1014_v20, %v1010_v49 }
 0x1e5   : > { %1425 = vset.pattern.permute.xlu1 %v1459_v6  ;;  %v1060_v6 = vpop.permute.xlu0 %1059 }
 0x1e6   : > { %1189 = vperm.xlu1 %1425, %v1164_v11  }
 0x1ea   : > { %1427 = vset.pattern.permute.xlu1 %v1460_v7  ;;  %v1076_v7 = vpop.permute.xlu0 %1075 }
 0x1eb   : > { %1221 = vperm.xlu1 %1427, %v1164_v11  }
 0x1ee   : > { %v1092_v63 = vpop.permute.xlu0 %1091 }
 0x1ef   : > { %1428 = vset.pattern.permute.xlu1 %v1461_v8 }
 0x1f0   : > { %1237 = vperm.xlu1 %1428, %v1164_v11  }
 0x1f2   : > { %v1108_v34 = vpop.permute.xlu0 %1107 }
 0x1f4   : > { %1430 = vset.pattern.permute.xlu1 %v2016_v5 }
 0x1f5   : > { %1269 = vperm.xlu1 %1430, %v1164_v11  }
 0x1f9   : > { %1431 = vset.pattern.permute.xlu1 %v1463_v10 }
 0x1fa   : > { %1285 = vperm.xlu1 %1431, %v1164_v11   ;;  %v1016_v11 = vadd.f32 %v1014_v20, %v1009_v43 }
 0x216   : > { %v1019_v26 = vpop.permute.xlu0 %1018 }
 0x217   : > { %v1021_v0 = vpop.permute.xlu1 %1020 }
 0x218   : > { %v1022_v10 = vsel %vm746_vm1, %v1019_v26, %v1021_v0  ;;  %v1023_v23 = vsel %vm746_vm1, %v1021_v0, %v1019_v26 }
 0x219   : > { %v1024_v37 = vmul.f32 %v1023_v23, %v1754_v62  ;;  %v1025_v41 = vmul.f32 %v1022_v10, %v1758_v32 }
 0x21b   : > { %v1035_v38 = vpop.permute.xlu1 %1034  ;;  %v1030_v45 = vmul.f32 %v1028_v54, %v1024_v37  ;;  %v1031_v27 = vmul.f32 %v1028_v54, %v1025_v41 }
 0x21d   : > { %v1033_v54 = vadd.f32 %v1031_v27, %v1017_v2 }
 0x21f   : > { %v1037_v52 = vpop.permute.xlu1 %1036 }
 0x220   : > { %v1038_v42 = vsel %vm771_vm2, %v1035_v38, %v1037_v52  ;;  %v1039_v17 = vsel %vm771_vm2, %v1037_v52, %v1035_v38 }
 0x221   : > { %v1040_v62 = vmul.f32 %v1039_v17, %v1767_v39  ;;  %v1041_v32 = vmul.f32 %v1038_v42, %v1771_v22 }
 0x223   : > { %v1051_v55 = vpop.permute.xlu1 %1050  ;;  %v1046_v9 = vmul.f32 %v1044_v1, %v1040_v62  ;;  %v1047_v0 = vmul.f32 %v1044_v1, %v1041_v32  ;;  %v1124_v43 = vpop.permute.xlu0 %1123 }
 0x225   : > { %v1049_v26 = vadd.f32 %v1047_v0, %v1033_v54 }
 0x227   : > { %v1053_v60 = vpop.permute.xlu1 %1052 }
 0x228   : > { %v1054_v53 = vsel %vm796_vm3, %v1051_v55, %v1053_v60  ;;  %v1055_v30 = vsel %vm796_vm3, %v1053_v60, %v1051_v55 }
 0x229   : > { %v1056_v40 = vmul.f32 %v1055_v30, %v1782_v47  ;;  %v1057_v46 = vmul.f32 %v1054_v53, %v1786_v48  ;;  %v1032_v47 = vadd.f32 %v1030_v45, %v1016_v11 }
 0x22b   : > { %v1067_v8 = vpop.permute.xlu1 %1066  ;;  %v1062_v52 = vmul.f32 %v1060_v6, %v1056_v40  ;;  %v1063_v55 = vmul.f32 %v1060_v6, %v1057_v46 }
 0x22d   : > { %v1065_v37 = vadd.f32 %v1063_v55, %v1049_v26 }
 0x22f   : > { %v1069_v4 = vpop.permute.xlu1 %1068 }
 0x230   : > { %v1070_v58 = vsel %vm821_vm4, %v1067_v8, %v1069_v4  ;;  %v1071_v28 = vsel %vm821_vm4, %v1069_v4, %v1067_v8 }
 0x231   : > { %v1072_v48 = vmul.f32 %v1071_v28, %v1795_v51  ;;  %v1073_v38 = vmul.f32 %v1070_v58, %v1801_v56 }
 0x233   : > { %v1083_v16 = vpop.permute.xlu1 %1082  ;;  %v1078_v6 = vmul.f32 %v1076_v7, %v1072_v48 }
 0x237   : > { %v1085_v35 = vpop.permute.xlu1 %1084 }
 0x238   : > { %v1086_v39 = vsel %vm846_vm5, %v1083_v16, %v1085_v35  ;;  %v1087_v22 = vsel %vm846_vm5, %v1085_v35, %v1083_v16  ;;  %v1048_v16 = vadd.f32 %v1046_v9, %v1032_v47  ;;  %v1079_v35 = vmul.f32 %v1076_v7, %v1073_v38 }
 0x239   : > { %v1088_v60 = vmul.f32 %v1086_v39, %v1806_v12  ;;  %v1089_v8 = vmul.f32 %v1087_v22, %v1810_v61 }
 0x23a   : > { %v1081_v53 = vadd.f32 %v1079_v35, %v1065_v37 }
 0x23b   : > { %v1099_v33 = vpop.permute.xlu1 %1098  ;;  %v1094_v12 = vmul.f32 %v1092_v63, %v1088_v60  ;;  %v1095_v41 = vmul.f32 %v1092_v63, %v1089_v8 }
 0x23d   : > { %v1097_v7 = vadd.f32 %v1095_v41, %v1081_v53 }
 0x23f   : > { %v1101_v50 = vpop.permute.xlu1 %1100 }
 0x240   : > { %v1102_v20 = vsel %vm871_vm6, %v1099_v33, %v1101_v50  ;;  %v1103_v1 = vsel %vm871_vm6, %v1101_v50, %v1099_v33  ;;  %v1064_v33 = vadd.f32 %v1062_v52, %v1048_v16 }
 0x241   : > { %v1104_v10 = vmul.f32 %v1102_v20, %v1821_v13  ;;  %v1105_v23 = vmul.f32 %v1103_v1, %v1825_v14 }
 0x242   : > { %v1080_v49 = vadd.f32 %v1078_v6, %v1064_v33 }
 0x243   : > { %v1115_v5 = vpop.permute.xlu1 %1114  ;;  %v1110_v30 = vmul.f32 %v1108_v34, %v1104_v10  ;;  %v1111_v50 = vmul.f32 %v1108_v34, %v1105_v23 }
 0x244   : > { %v1096_v62 = vadd.f32 %v1094_v12, %v1080_v49 }
 0x245   : > { %v1113_v27 = vadd.f32 %v1111_v50, %v1097_v7 }
 0x247   : > { %v1117_v4 = vpop.permute.xlu1 %1116 }
 0x248   : > { %v1118_v51 = vsel %vm896_vm7, %v1115_v5, %v1117_v4  ;;  %v1119_v56 = vsel %vm896_vm7, %v1117_v4, %v1115_v5 }
 0x249   : > { %v1120_v61 = vmul.f32 %v1118_v51, %v1842_v25  ;;  %v1121_v42 = vmul.f32 %v1119_v56, %v1846_v29  ;;  %v1140_v25 = vpop.permute.xlu0 %1139  ;;  %v1112_v29 = vadd.f32 %v1110_v30, %v1096_v62 }
 0x24b   : > { %v1131_v17 = vpop.permute.xlu1 %1130  ;;  %v1126_v32 = vmul.f32 %v1124_v43, %v1120_v61  ;;  %v1127_v13 = vmul.f32 %v1124_v43, %v1121_v42 }
 0x24d   : > { %v1128_v58 = vadd.f32 %v1126_v32, %v1112_v29  ;;  %v1129_v34 = vadd.f32 %v1127_v13, %v1113_v27  ;;  %v1169_v26 = vpop.permute.xlu0 %1168 }
 0x24f   : > { %v1133_v45 = vpop.permute.xlu1 %1132 }
 0x250   : > { %v1134_v14 = vsel %vm921_vm8, %v1131_v17, %v1133_v45  ;;  %v1135_v63 = vsel %vm921_vm8, %v1133_v45, %v1131_v17 }
 0x251   : > { %v1136_v40 = vmul.f32 %v1134_v14, %v1859_v15  ;;  %v1137_v46 = vmul.f32 %v1135_v63, %v1863_v57  ;;  %v1206_v61 = vpop.permute.xlu0 %1205 }
 0x253   : > { %v1142_v28 = vmul.f32 %v1140_v25, %v1136_v40  ;;  %v1143_v11 = vmul.f32 %v1140_v25, %v1137_v46 }
 0x255   : > { %v1144_v2 = vadd.f32 %v1142_v28, %v1128_v58  ;;  %v1145_v5 = vadd.f32 %v1143_v11, %v1129_v34  ;;  %v1254_v40 = vpop.permute.xlu0 %1253 }
 0x257   : > { %v1148_v9 = vmul.f32 0.044715, %v1144_v2  ;;  %v1149_v0 = vmul.f32 0.044715, %v1145_v5  ;;  %v1146_v60 = vmul.f32 0.5, %v1144_v2  ;;  %v1147_v4 = vmul.f32 0.5, %v1145_v5 }
 0x259   : > { %v1150_v39 = vmul.f32 %v1148_v9, %v1144_v2  ;;  %v1151_v22 = vmul.f32 %v1149_v0, %v1145_v5 }
 0x25b   : > { %v1152_v47 = vmul.f32 %v1150_v39, %v1144_v2  ;;  %v1153_v18 = vmul.f32 %v1151_v22, %v1145_v5 }
 0x25c   : > { %v1184_v15 = vpop.permute.xlu1 %1183 }
 0x25d   : > { %v1154_v54 = vadd.f32 %v1152_v47, %v1144_v2  ;;  %v1155_v48 = vadd.f32 %v1153_v18, %v1145_v5 }
 0x25f   : > { %v1156_v38 = vmul.f32 0.7978846, %v1154_v54  ;;  %v1157_v52 = vmul.f32 0.7978846, %v1155_v48 }
 0x261   : > { %1445 = vtanh.f32 %v1156_v38  ;;  %v1190_v57 = vpop.permute.xlu1 %1189 }
 0x262   : > { %1447 = vtanh.f32 %v1157_v52 }
 0x266   : > { %v1222_v20 = vpop.permute.xlu1 %1221 }
 0x26b   : > { %v1238_v33 = vpop.permute.xlu1 %1237 }
 0x26e   : > { %v1446_v55 = vpop.eup %1445 }
 0x26f   : > { %v1448_v1 = vpop.eup %1447  ;;  %v1160_v8 = vadd.f32 1.0, %v1446_v55 }
 0x270   : > { %v1161_v16 = vadd.f32 1.0, %v1448_v1  ;;  %v1270_v45 = vpop.permute.xlu1 %1269 }
 0x271   : > { %v1162_v51 = vmul.f32 %v1160_v8, %v1146_v60 }
 0x272   : > { %v1163_v56 = vmul.f32 %v1161_v16, %v1147_v4 }
 0x273   : > { %v1195_v6 = vrot.slane %v1162_v51, %v1648_v21  ;;  %v1174_v35 = vrot.slane %v1162_v51, %v1639_v19  ;;  %v1227_v12 = vrot.slane %v1162_v51, %v1667_v31  ;;  %v1211_v49 = vrot.slane %v1162_v51, %v1656_v24 }
 0x274   : > { %v1199_v10 = vrot.slane %v1163_v56, %v1648_v21  ;;  %v1178_v23 = vrot.slane %v1163_v56, %v1639_v19  ;;  %v1215_v43 = vrot.slane %v1163_v56, %v1656_v24  ;;  %v1231_v30 = vrot.slane %v1163_v56, %v1667_v31 }
 0x275   : > { %v1179_v37 = vmul.f32 %v1174_v35, %v1169_v26  ;;  %v1200_v42 = vmul.f32 %v1195_v6, %v1190_v57  ;;  %v1243_v21 = vrot.slane %v1162_v51, %v1676_v36  ;;  %v1216_v19 = vmul.f32 %v1211_v49, %v1206_v61  ;;  %v1286_v39 = vpop.permute.xlu1 %1285 }
 0x276   : > { %v1180_v41 = vmul.f32 %v1178_v23, %v1169_v26  ;;  %v1201_v53 = vmul.f32 %v1199_v10, %v1190_v57  ;;  %v1247_v7 = vrot.slane %v1163_v56, %v1676_v36  ;;  %v1217_v13 = vmul.f32 %v1215_v43, %v1206_v61 }
 0x277   : > { %v1186_v17 = vadd.f32 %v1184_v15, %v1179_v37  ;;  %v1232_v14 = vmul.f32 %v1227_v12, %v1222_v20  ;;  %v1259_v25 = vrot.slane %v1162_v51, %v1683_v44  ;;  %v1233_v27 = vmul.f32 %v1231_v30, %v1222_v20 }
 0x278   : > { %v1187_v50 = vadd.f32 %v1184_v15, %v1180_v41  ;;  %v1263_v24 = vrot.slane %v1163_v56, %v1683_v44  ;;  %v1248_v31 = vmul.f32 %v1243_v21, %v1238_v33  ;;  %v1275_v58 = vrot.slane %v1162_v51, %v1696_v59 }
 0x279   : > { %v1202_v62 = vadd.f32 %v1200_v42, %v1186_v17  ;;  %v1249_v34 = vmul.f32 %v1247_v7, %v1238_v33  ;;  %v1279_v36 = vrot.slane %v1163_v56, %v1696_v59  ;;  %v1264_v2 = vmul.f32 %v1259_v25, %v1254_v40 }
 0x27a   : > { %v1203_v32 = vadd.f32 %v1201_v53, %v1187_v50  ;;  %v1291_v5 = vrot.slane %v1162_v51, %v1699_v3  ;;  %v1265_v0 = vmul.f32 %v1263_v24, %v1254_v40  ;;  %v1295_v22 = vrot.slane %v1163_v56, %v1699_v3 }
 0x27b   : > { %v1218_v63 = vadd.f32 %v1216_v19, %v1202_v62  ;;  %v1280_v44 = vmul.f32 %v1275_v58, %v1270_v45  ;;  %v1281_v18 = vmul.f32 %v1279_v36, %v1270_v45 }
 0x27c   : > { %v1219_v29 = vadd.f32 %v1217_v13, %v1203_v32  ;;  %v1296_v38 = vmul.f32 %v1291_v5, %v1286_v39  ;;  %v1297_v52 = vmul.f32 %v1295_v22, %v1286_v39 }
 0x27d   : > { %v1234_v46 = vadd.f32 %v1232_v14, %v1218_v63 }
 0x27e   : > { %v1235_v28 = vadd.f32 %v1233_v27, %v1219_v29 }
 0x27f   : > { %v1250_v11 = vadd.f32 %v1248_v31, %v1234_v46 }
 0x280   : > { %v1251_v9 = vadd.f32 %v1249_v34, %v1235_v28 }
 0x281   : > { %v1266_v47 = vadd.f32 %v1264_v2, %v1250_v11 }
 0x282   : > { %v1267_v54 = vadd.f32 %v1265_v0, %v1251_v9 }
 0x283   : > { %v1282_v48 = vadd.f32 %v1280_v44, %v1266_v47 }
 0x284   : > { %v1283_v59 = vadd.f32 %v1281_v18, %v1267_v54 }
 0x285   : > { %v1298_v15 = vadd.f32 %v1296_v38, %v1282_v48 }
 0x286   : > { %v1299_v57 = vadd.f32 %v1297_v52, %v1283_v59 }
 0x287   : > { %1300 = vst [vmem:[%s494_s25] sm:$0xff] %v1298_v15 }
 0x288   : > { %1301 = vst [vmem:[%s494_s25 + $0x8] sm:$0xff] %v1299_v57 }
 0x289 PF: > { %s25_s18 = sadd.s32 1, %s1455_s18  }
 0x28a   : > { %p22_p4 = scmp.ge.s32.totalorder %s25_s18, 4  }
 0x28c   :  { %24 = sbr.rel (!%p22_p4) target bundleno = 1 (0x1), region = 110 }

</bundles_post_ra>
